<compile_context>
chip_gen: v5e
topology: v5e:2x2
jax: 0.10.0
libtpu: 0.0.40
codegen_flags: <defaults>
</compile_context>

<pallas_src>
import functools

import jax
import jax.numpy as jnp
import numpy as np
from jax.experimental import pallas as pl
from jax.experimental.pallas import tpu as pltpu

# ---- problem constants (from the PyTorch module) ----------------------------
C_IN = 400
C_OUT = 400
GROUPS = 25
CG_IN = C_IN // GROUPS           # 16 input channels per group
CG_OUT = C_OUT // GROUPS         # 16 output channels per group
KH = KW = 3
NTAP = KH * KW                   # 9 taps
STRIDE = 2
PAD = 1
H = W = 14
OH = (H + 2 * PAD - KH) // STRIDE + 1    # 7
OW = (W + 2 * PAD - KW) // STRIDE + 1    # 7

# ---- packing constants -------------------------------------------------------
GB = 8                            # groups packed per matmul block
NBLK = -(-GROUPS // GB)           # 4 blocks (7 zero-padded groups total)
GROUPS_PAD = GB * NBLK            # 32
C_PAD = GROUPS_PAD * CG_IN        # 512 padded input channels (= NBLK * 128)
CBLK = GB * CG_IN                 # 128 input channels per block (lane dim)
KBLK = NTAP * CBLK                # 1152 = 9 * 128 contraction per block
NOUT = GB * CG_OUT                # 128 output channels per block (lane dense)
OWP = 8                           # output width padded 7 -> 8
MPAD = OH * OWP                   # 56 padded output positions (sublane aligned)


def _block_conv_kernel(p_ref, w_ref, o_ref):
    # p_ref: [4, 56, 1152] bf16 im2col patches (tap-major K ordering)
    # w_ref: [4, 1152, 128] bf16 block-diagonal weights
    # o_ref: [4, 56, 128]   f32
    for b in range(NBLK):                       # static unroll: 4 MXU matmuls
        o_ref[b] = jnp.dot(p_ref[b], w_ref[b],
                           preferred_element_type=jnp.float32)


def pack_weights(weight):
    """[400, 16, 3, 3] OIHW -> block-diagonal [4, 1152, 128] bf16. Run once.

    Within a block b (groups b*8 .. b*8+7):
      K index: k = tap*128 + group_local*16 + ci
      N index: n = group_local*16 + co
    """
    w = np.asarray(weight, dtype=np.float32)
    wp = np.zeros((NBLK, KBLK, NOUT), dtype=np.float32)
    for g in range(GROUPS):
        b, gl = divmod(g, GB)
        for t in range(NTAP):
            kh, kw = divmod(t, KW)
            blk = w[g * CG_OUT:(g + 1) * CG_OUT, :, kh, kw]       # [co, ci]
            r0 = t * CBLK + gl * CG_IN
            c0 = gl * CG_OUT
            wp[b, r0:r0 + CG_IN, c0:c0 + CG_OUT] = blk.T          # [ci, co]
    return jnp.asarray(wp).astype(jnp.bfloat16)


@jax.jit
def relu_grouped_conv(x, w_packed):
    """x: [1, 400, 14, 14] f32. w_packed: [4, 1152, 128] bf16 (pack_weights).
    Returns Conv2d(ReLU(x)) as [1, 400, 7, 7] f32."""
    # ReLU in f32, then a single bf16 cast (max(0,.) commutes with the cast).
    xb = jnp.maximum(x[0], 0.0).astype(jnp.bfloat16)               # [400,14,14]
    xb = jnp.pad(xb, ((0, C_PAD - C_IN), (0, 0), (0, 0)))          # [512,14,14]
    # Conv zero-padding (1 each side) plus 2 extra right columns feeding the
    # junk 8th output column (its values are discarded in the epilogue).
    xp = jnp.pad(xb, ((0, 0), (PAD, PAD), (PAD, PAD + 2)))         # [512,16,18]
    xp = xp.transpose(1, 2, 0)                                     # [16,18,512]

    # im2col, emitted directly in [NBLK, MPAD, KBLK] order with tap-major K
    # (matches pack_weights) -- no extra relayout transpose of the patches.
    taps = [xp[kh:kh + STRIDE * OH:STRIDE, kw:kw + STRIDE * OWP:STRIDE, :]
            for kh in range(KH) for kw in range(KW)]               # 9 x [7,8,512]
    p = jnp.stack(taps, axis=2)                                    # [7,8,9,512]
    p = p.reshape(OH, OWP, NTAP, NBLK, CBLK)                       # [7,8,9,4,128]
    pats = p.transpose(3, 0, 1, 2, 4).reshape(NBLK, MPAD, KBLK)    # [4,56,1152]

    out = pl.pallas_call(
        _block_conv_kernel,
        out_shape=jax.ShapeDtypeStruct((NBLK, MPAD, NOUT), jnp.float32),
        grid=(1,),
        in_specs=[
            pl.BlockSpec((NBLK, MPAD, KBLK), lambda i: (0, 0, 0)),
            pl.BlockSpec((NBLK, KBLK, NOUT), lambda i: (0, 0, 0)),
        ],
        out_specs=pl.BlockSpec((NBLK, MPAD, NOUT), lambda i: (0, 0, 0)),
        compiler_params=pltpu.CompilerParams(
            dimension_semantics=("arbitrary",)),
    )(pats, w_packed)                                              # [4,56,128]

    # [4,56,128] -> [1,400,7,7]: drop junk output column + 7 padded groups.
    o = out.reshape(NBLK, OH, OWP, GB, CG_OUT)[:, :, :OW]          # [4,7,7,8,16]
    o = o.transpose(0, 3, 4, 1, 2).reshape(GROUPS_PAD, CG_OUT, OH, OW)
    return o[:GROUPS].reshape(1, C_OUT, OH, OW)


if __name__ == "__main__":
    key = jax.random.PRNGKey(0)
    kx, kw_key = jax.random.split(key)
    x = jax.random.normal(kx, (1, C_IN, H, W), dtype=jnp.float32)
    weight = jax.random.normal(kw_key, (C_OUT, CG_IN, KH, KW),
                               dtype=jnp.float32) * 0.05

    w_packed = pack_weights(weight)          # one-time, outside the jitted hot path
    y = relu_grouped_conv(x, w_packed)
    y = jax.block_until_ready(y)
    assert y.shape == (1, C_OUT, OH, OW)

    # Silent correctness checks against XLA's grouped convolution.
    conv = functools.partial(
        jax.lax.conv_general_dilated,
        window_strides=(STRIDE, STRIDE),
        padding=((PAD, PAD), (PAD, PAD)),
        dimension_numbers=("NCHW", "OIHW", "NCHW"),
        feature_group_count=GROUPS)
    # (a) strict check against a bf16-quantized reference (same operand rounding).
    x_q = jnp.maximum(x, 0.0).astype(jnp.bfloat16).astype(jnp.float32)
    w_q = weight.astype(jnp.bfloat16).astype(jnp.float32)
    ref_q = conv(x_q, w_q)
    assert jnp.allclose(y, ref_q, atol=2e-3, rtol=2e-3)
    # (b) looser check against the exact f32 module semantics (bf16 operand rounding).
    ref = conv(jnp.maximum(x, 0.0), weight)
    assert jnp.allclose(y, ref, atol=3e-2, rtol=3e-2)

    print("KERNEL_OK")
</pallas_src>

<mosaic_0001>
module attributes {stable_mosaic.version = 11 : i64} {
  func.func @_block_conv_kernel(%arg0: i32, %arg1: memref<4x56x1152xbf16, #tpu.memory_space<vmem>>, %arg2: memref<4x1152x128xbf16, #tpu.memory_space<vmem>>, %arg3: memref<4x56x128xf32, #tpu.memory_space<vmem>>) attributes {dimension_semantics = [#tpu.dimension_semantics<arbitrary>], iteration_bounds = array<i64: 1>, scalar_prefetch = 0 : i64, scratch_operands = 0 : i64, tpu.core_type = #tpu.core_type<tc>, window_params = [{pipeline_mode = #tpu.pipeline_mode<synchronous>, transform_indices = @transform_0, window_bounds = array<i64: 4, 56, 1152>}, {pipeline_mode = #tpu.pipeline_mode<synchronous>, transform_indices = @transform_1, window_bounds = array<i64: 4, 1152, 128>}, {pipeline_mode = #tpu.pipeline_mode<synchronous>, transform_indices = @transform_2, window_bounds = array<i64: 4, 56, 128>}]} {
    %c0 = arith.constant 0 : index
    %c0_0 = arith.constant 0 : index
    %c0_1 = arith.constant 0 : index
    %0 = vector.load %arg1[%c0, %c0_0, %c0_1] : memref<4x56x1152xbf16, #tpu.memory_space<vmem>>, vector<1x56x1152xbf16>
    %1 = vector.shape_cast %0 : vector<1x56x1152xbf16> to vector<56x1152xbf16>
    %c0_2 = arith.constant 0 : index
    %c0_3 = arith.constant 0 : index
    %c0_4 = arith.constant 0 : index
    %2 = vector.load %arg2[%c0_2, %c0_3, %c0_4] : memref<4x1152x128xbf16, #tpu.memory_space<vmem>>, vector<1x1152x128xbf16>
    %3 = vector.shape_cast %2 : vector<1x1152x128xbf16> to vector<1152x128xbf16>
    %cst = arith.constant dense<0.000000e+00> : vector<56x128xf32>
    %4 = tpu.matmul %1, %3, %cst {dimension_numbers = #tpu.dot_dimension_numbers<[1], [0], [0], [1], [0, 0, 1, 1], [], []>} : vector<56x1152xbf16>, vector<1152x128xbf16>, vector<56x128xf32> -> vector<56x128xf32>
    %c0_5 = arith.constant 0 : index
    %c0_6 = arith.constant 0 : index
    %c0_7 = arith.constant 0 : index
    %5 = vector.load %arg3[%c0_5, %c0_6, %c0_7] : memref<4x56x128xf32, #tpu.memory_space<vmem>>, vector<1x56x128xf32>
    %6 = vector.shape_cast %5 : vector<1x56x128xf32> to vector<56x128xf32>
    %7 = vector.shape_cast %4 : vector<56x128xf32> to vector<1x56x128xf32>
    tpu.vector_store %arg3[%c0_5, %c0_6, %c0_7], %7 {strides = array<i32>} : memref<4x56x128xf32, #tpu.memory_space<vmem>>, vector<1x56x128xf32>,
    %c1 = arith.constant 1 : index
    %c0_8 = arith.constant 0 : index
    %c0_9 = arith.constant 0 : index
    %8 = vector.load %arg1[%c1, %c0_8, %c0_9] : memref<4x56x1152xbf16, #tpu.memory_space<vmem>>, vector<1x56x1152xbf16>
    %9 = vector.shape_cast %8 : vector<1x56x1152xbf16> to vector<56x1152xbf16>
    %c1_10 = arith.constant 1 : index
    %c0_11 = arith.constant 0 : index
    %c0_12 = arith.constant 0 : index
    %10 = vector.load %arg2[%c1_10, %c0_11, %c0_12] : memref<4x1152x128xbf16, #tpu.memory_space<vmem>>, vector<1x1152x128xbf16>
    %11 = vector.shape_cast %10 : vector<1x1152x128xbf16> to vector<1152x128xbf16>
    %cst_13 = arith.constant dense<0.000000e+00> : vector<56x128xf32>
    %12 = tpu.matmul %9, %11, %cst_13 {dimension_numbers = #tpu.dot_dimension_numbers<[1], [0], [0], [1], [0, 0, 1, 1], [], []>} : vector<56x1152xbf16>, vector<1152x128xbf16>, vector<56x128xf32> -> vector<56x128xf32>
    %c1_14 = arith.constant 1 : index
    %c0_15 = arith.constant 0 : index
    %c0_16 = arith.constant 0 : index
    %13 = vector.load %arg3[%c1_14, %c0_15, %c0_16] : memref<4x56x128xf32, #tpu.memory_space<vmem>>, vector<1x56x128xf32>
    %14 = vector.shape_cast %13 : vector<1x56x128xf32> to vector<56x128xf32>
    %15 = vector.shape_cast %12 : vector<56x128xf32> to vector<1x56x128xf32>
    tpu.vector_store %arg3[%c1_14, %c0_15, %c0_16], %15 {strides = array<i32>} : memref<4x56x128xf32, #tpu.memory_space<vmem>>, vector<1x56x128xf32>,
    %c2 = arith.constant 2 : index
    %c0_17 = arith.constant 0 : index
    %c0_18 = arith.constant 0 : index
    %16 = vector.load %arg1[%c2, %c0_17, %c0_18] : memref<4x56x1152xbf16, #tpu.memory_space<vmem>>, vector<1x56x1152xbf16>
    %17 = vector.shape_cast %16 : vector<1x56x1152xbf16> to vector<56x1152xbf16>
    %c2_19 = arith.constant 2 : index
    %c0_20 = arith.constant 0 : index
    %c0_21 = arith.constant 0 : index
    %18 = vector.load %arg2[%c2_19, %c0_20, %c0_21] : memref<4x1152x128xbf16, #tpu.memory_space<vmem>>, vector<1x1152x128xbf16>
    %19 = vector.shape_cast %18 : vector<1x1152x128xbf16> to vector<1152x128xbf16>
    %cst_22 = arith.constant dense<0.000000e+00> : vector<56x128xf32>
    %20 = tpu.matmul %17, %19, %cst_22 {dimension_numbers = #tpu.dot_dimension_numbers<[1], [0], [0], [1], [0, 0, 1, 1], [], []>} : vector<56x1152xbf16>, vector<1152x128xbf16>, vector<56x128xf32> -> vector<56x128xf32>
    %c2_23 = arith.constant 2 : index
    %c0_24 = arith.constant 0 : index
    %c0_25 = arith.constant 0 : index
    %21 = vector.load %arg3[%c2_23, %c0_24, %c0_25] : memref<4x56x128xf32, #tpu.memory_space<vmem>>, vector<1x56x128xf32>
    %22 = vector.shape_cast %21 : vector<1x56x128xf32> to vector<56x128xf32>
    %23 = vector.shape_cast %20 : vector<56x128xf32> to vector<1x56x128xf32>
    tpu.vector_store %arg3[%c2_23, %c0_24, %c0_25], %23 {strides = array<i32>} : memref<4x56x128xf32, #tpu.memory_space<vmem>>, vector<1x56x128xf32>,
    %c3 = arith.constant 3 : index
    %c0_26 = arith.constant 0 : index
    %c0_27 = arith.constant 0 : index
    %24 = vector.load %arg1[%c3, %c0_26, %c0_27] : memref<4x56x1152xbf16, #tpu.memory_space<vmem>>, vector<1x56x1152xbf16>
    %25 = vector.shape_cast %24 : vector<1x56x1152xbf16> to vector<56x1152xbf16>
    %c3_28 = arith.constant 3 : index
    %c0_29 = arith.constant 0 : index
    %c0_30 = arith.constant 0 : index
    %26 = vector.load %arg2[%c3_28, %c0_29, %c0_30] : memref<4x1152x128xbf16, #tpu.memory_space<vmem>>, vector<1x1152x128xbf16>
    %27 = vector.shape_cast %26 : vector<1x1152x128xbf16> to vector<1152x128xbf16>
    %cst_31 = arith.constant dense<0.000000e+00> : vector<56x128xf32>
    %28 = tpu.matmul %25, %27, %cst_31 {dimension_numbers = #tpu.dot_dimension_numbers<[1], [0], [0], [1], [0, 0, 1, 1], [], []>} : vector<56x1152xbf16>, vector<1152x128xbf16>, vector<56x128xf32> -> vector<56x128xf32>
    %c3_32 = arith.constant 3 : index
    %c0_33 = arith.constant 0 : index
    %c0_34 = arith.constant 0 : index
    %29 = vector.load %arg3[%c3_32, %c0_33, %c0_34] : memref<4x56x128xf32, #tpu.memory_space<vmem>>, vector<1x56x128xf32>
    %30 = vector.shape_cast %29 : vector<1x56x128xf32> to vector<56x128xf32>
    %31 = vector.shape_cast %28 : vector<56x128xf32> to vector<1x56x128xf32>
    tpu.vector_store %arg3[%c3_32, %c0_33, %c0_34], %31 {strides = array<i32>} : memref<4x56x128xf32, #tpu.memory_space<vmem>>, vector<1x56x128xf32>,
    return
  }
  func.func @transform_0(%arg0: i32) -> (i32, i32, i32) {
    %c0_i32 = arith.constant 0 : i32
    %c0_i32_0 = arith.constant 0 : i32
    %c0_i32_1 = arith.constant 0 : i32
    %c0_i32_2 = arith.constant 0 : i32
    return %c0_i32, %c0_i32_0, %c0_i32_1 : i32, i32, i32
  }
  func.func @transform_1(%arg0: i32) -> (i32, i32, i32) {
    %c0_i32 = arith.constant 0 : i32
    %c0_i32_0 = arith.constant 0 : i32
    %c0_i32_1 = arith.constant 0 : i32
    %c0_i32_2 = arith.constant 0 : i32
    return %c0_i32, %c0_i32_0, %c0_i32_1 : i32, i32, i32
  }
  func.func @transform_2(%arg0: i32) -> (i32, i32, i32) {
    %c0_i32 = arith.constant 0 : i32
    %c0_i32_0 = arith.constant 0 : i32
    %c0_i32_1 = arith.constant 0 : i32
    %c0_i32_2 = arith.constant 0 : i32
    return %c0_i32, %c0_i32_0, %c0_i32_1 : i32, i32, i32
  }
}

</mosaic_0001>

<bundles_post_ra>
// kernel: relu_grouped_conv.1
= control target key start
LH: loop header
LB: loop body
LE: loop exit
PB: predicated region body
PF: predicated region fallthrough
CT: control target
= control target key end

     0   :  { %s8769_s1 = inlined_call_operand.vmem [shape: bf16[4,1152,128], index: 1, kind: input, shape index: {}]   ;;  %s8770_s0 = inlined_call_operand.vmem [shape: bf16[4,56,1152], index: 0, kind: input, shape index: {}]   ;;  %s8771_s2 = inlined_call_operand.vmem [shape: f32[4,56,128], index: 2, kind: output, shape index: {}]  }
   0x1   :  { %v6360_v0 = vld [vmem:[%s8769_s1 + $0x38] sm:$0xff]  ;;  %v6359_v4 = vld [vmem:[%s8769_s1 + $0x30] sm:$0xff]  ;;  %v6358_v8 = vld [vmem:[%s8769_s1 + $0x28] sm:$0xff] }
   0x2   :  { %v6368_v1 = vld [vmem:[%s8769_s1 + $0x78] sm:$0xff]  ;;  %792 = vmatpush.bf16.msra.mxu0 %v6360_v0  ;;  %v6367_v5 = vld [vmem:[%s8769_s1 + $0x70] sm:$0xff]  ;;  %v6366_v9 = vld [vmem:[%s8769_s1 + $0x68] sm:$0xff] }
   0x3   :  { %v6376_v2 = vld [vmem:[%s8769_s1 + $0xb8] sm:$0xff]  ;;  %820 = vmatpush.bf16.msra.mxu1 %v6368_v1  ;;  %v6375_v6 = vld [vmem:[%s8769_s1 + $0xb0] sm:$0xff]  ;;  %v6374_v10 = vld [vmem:[%s8769_s1 + $0xa8] sm:$0xff] }
   0x4   :  { %v6384_v3 = vld [vmem:[%s8769_s1 + $0xf8] sm:$0xff]  ;;  %848 = vmatpush.bf16.msra.mxu2 %v6376_v2  ;;  %v6383_v7 = vld [vmem:[%s8769_s1 + $0xf0] sm:$0xff]  ;;  %v6382_v11 = vld [vmem:[%s8769_s1 + $0xe8] sm:$0xff] }
   0x5   :  { %876 = vmatpush.bf16.msra.mxu3 %v6384_v3  ;;  %v6357_v12 = vld [vmem:[%s8769_s1 + $0x20] sm:$0xff]  ;;  %v6356_v16 = vld [vmem:[%s8769_s1 + $0x18] sm:$0xff]  ;;  %v6355_v20 = vld [vmem:[%s8769_s1 + $0x10] sm:$0xff] }
   0x6   :  { %793 = vmatpush.bf16.msra.mxu0 %v6359_v4  ;;  %v6365_v13 = vld [vmem:[%s8769_s1 + $0x60] sm:$0xff]  ;;  %v6364_v17 = vld [vmem:[%s8769_s1 + $0x58] sm:$0xff]  ;;  %v6363_v21 = vld [vmem:[%s8769_s1 + $0x50] sm:$0xff] }
   0x7   :  { %821 = vmatpush.bf16.msra.mxu1 %v6367_v5  ;;  %v6373_v14 = vld [vmem:[%s8769_s1 + $0xa0] sm:$0xff]  ;;  %v6372_v18 = vld [vmem:[%s8769_s1 + $0x98] sm:$0xff]  ;;  %v6371_v22 = vld [vmem:[%s8769_s1 + $0x90] sm:$0xff] }
   0x8   :  { %849 = vmatpush.bf16.msra.mxu2 %v6375_v6  ;;  %v6381_v15 = vld [vmem:[%s8769_s1 + $0xe0] sm:$0xff]  ;;  %v6380_v19 = vld [vmem:[%s8769_s1 + $0xd8] sm:$0xff]  ;;  %v6379_v23 = vld [vmem:[%s8769_s1 + $0xd0] sm:$0xff] }
   0x9   :  { %877 = vmatpush.bf16.msra.mxu3 %v6383_v7  ;;  %v6354_v24 = vld [vmem:[%s8769_s1 + $0x8] sm:$0xff]  ;;  %v6353_v28 = vld [vmem:[%s8769_s1] sm:$0xff]  ;;  %v4196_v39 = vld [vmem:[%s8770_s0 + $0x2c] sm:$0xf0] }
   0xa   :  { %794 = vmatpush.bf16.msra.mxu0 %v6358_v8  ;;  %v6362_v25 = vld [vmem:[%s8769_s1 + $0x48] sm:$0xff]  ;;  %v6361_v29 = vld [vmem:[%s8769_s1 + $0x40] sm:$0xff]  ;;  %v6408_v40 = vld [vmem:[%s8769_s1 + $0x1b8] sm:$0xff] }
   0xb   :  { %822 = vmatpush.bf16.msra.mxu1 %v6366_v9  ;;  %v6370_v26 = vld [vmem:[%s8769_s1 + $0x88] sm:$0xff]  ;;  %v6369_v30 = vld [vmem:[%s8769_s1 + $0x80] sm:$0xff]  ;;  %v6416_v41 = vld [vmem:[%s8769_s1 + $0x1f8] sm:$0xff] }
   0xc   :  { %850 = vmatpush.bf16.msra.mxu2 %v6374_v10  ;;  %v6378_v27 = vld [vmem:[%s8769_s1 + $0xc8] sm:$0xff]  ;;  %v6377_v31 = vld [vmem:[%s8769_s1 + $0xc0] sm:$0xff]  ;;  %v6392_v46 = vld [vmem:[%s8769_s1 + $0x138] sm:$0xff] }
   0xd   :  { %878 = vmatpush.bf16.msra.mxu3 %v6382_v11  ;;  %v4186_v32 = vld [vmem:[%s8770_s0] sm:$0xf]  ;;  %v6330_v33 = vld [vmem:[%s8770_s0 + $0x20] sm:$0xf0]  ;;  %v4188_v35 = vld [vmem:[%s8770_s0 + $0x24] sm:$0xf0] }
   0xe   :  { %795 = vmatpush.bf16.msra.mxu0 %v6357_v12  ;;  %v6326_v34 = vld [vmem:[%s8770_s0 + $0x4] sm:$0xf]  ;;  %v4194_v36 = vld [vmem:[%s8770_s0 + $0x8] sm:$0xf]  ;;  %v6331_v37 = vld [vmem:[%s8770_s0 + $0x28] sm:$0xf0]  ;;  %v4187_v42 = vor.u32 %v6330_v33, %v4186_v32 }
   0xf   :  { %823 = vmatpush.bf16.msra.mxu1 %v6365_v13  ;;  %v6327_v38 = vld [vmem:[%s8770_s0 + $0xc] sm:$0xf]  ;;  %v4191_v43 = vor.u32 %v6326_v34, %v4188_v35  ;;  %v4195_v44 = vor.u32 %v6331_v37, %v4194_v36  ;;  %v6400_v47 = vld [vmem:[%s8769_s1 + $0x178] sm:$0xff]  ;;  %v6407_v48 = vld [vmem:[%s8769_s1 + $0x1b0] sm:$0xff] }
  0x10   :  { %851 = vmatpush.bf16.msra.mxu2 %v6373_v14  ;;  %v4199_v45 = vor.u32 %v6327_v38, %v4196_v39  ;;  %v6415_v49 = vld [vmem:[%s8769_s1 + $0x1f0] sm:$0xff]  ;;  %v6406_v52 = vld [vmem:[%s8769_s1 + $0x1a8] sm:$0xff]  ;;  %v6405_v57 = vld [vmem:[%s8769_s1 + $0x1a0] sm:$0xff] }
  0x11   :  { %879 = vmatpush.bf16.msra.mxu3 %v6381_v15  ;;  %v6391_v50 = vld [vmem:[%s8769_s1 + $0x130] sm:$0xff]  ;;  %v6414_v53 = vld [vmem:[%s8769_s1 + $0x1e8] sm:$0xff]  ;;  %v6413_v58 = vld [vmem:[%s8769_s1 + $0x1e0] sm:$0xff] }
  0x12   :  { %796 = vmatpush.bf16.msra.mxu0 %v6356_v16  ;;  %v6399_v51 = vld [vmem:[%s8769_s1 + $0x170] sm:$0xff]  ;;  %v6390_v54 = vld [vmem:[%s8769_s1 + $0x128] sm:$0xff]  ;;  %v4232_v1 = vld [vmem:[%s8770_s0 + $0x74] sm:$0xf0] }
  0x13   :  { %824 = vmatpush.bf16.msra.mxu1 %v6364_v17  ;;  %v6398_v55 = vld [vmem:[%s8769_s1 + $0x168] sm:$0xff]  ;;  %v4224_v61 = vld [vmem:[%s8770_s0 + $0x6c] sm:$0xf0]  ;;  %v6340_v63 = vld [vmem:[%s8770_s0 + $0x70] sm:$0xf0] }
  0x14   :  { %852 = vmatpush.bf16.msra.mxu2 %v6372_v18  ;;  %v4222_v56 = vld [vmem:[%s8770_s0 + $0x48] sm:$0xf]  ;;  %v6339_v59 = vld [vmem:[%s8770_s0 + $0x68] sm:$0xf0]  ;;  %v4230_v62 = vld [vmem:[%s8770_s0 + $0x50] sm:$0xf] }
  0x15   :  { %880 = vmatpush.bf16.msra.mxu3 %v6380_v19  ;;  %v6335_v60 = vld [vmem:[%s8770_s0 + $0x4c] sm:$0xf]  ;;  %v6336_v0 = vld [vmem:[%s8770_s0 + $0x54] sm:$0xf]  ;;  %v6389_v2 = vld [vmem:[%s8769_s1 + $0x120] sm:$0xff]  ;;  %v4223_v6 = vor.u32 %v6339_v59, %v4222_v56  ;;  %v4231_v8 = vor.u32 %v6340_v63, %v4230_v62 }
  0x16   :  { %797 = vmatpush.bf16.msra.mxu0 %v6355_v20  ;;  %v6397_v3 = vld [vmem:[%s8769_s1 + $0x160] sm:$0xff]  ;;  %v6404_v4 = vld [vmem:[%s8769_s1 + $0x198] sm:$0xff]  ;;  %v4227_v7 = vor.u32 %v6335_v60, %v4224_v61  ;;  %v4235_v9 = vor.u32 %v6336_v0, %v4232_v1  ;;  %v6403_v12 = vld [vmem:[%s8769_s1 + $0x190] sm:$0xff] }
  0x17   :  { %825 = vmatpush.bf16.msra.mxu1 %v6363_v21  ;;  %v6412_v5 = vld [vmem:[%s8769_s1 + $0x1d8] sm:$0xff]  ;;  %v6411_v13 = vld [vmem:[%s8769_s1 + $0x1d0] sm:$0xff]  ;;  %v6402_v16 = vld [vmem:[%s8769_s1 + $0x188] sm:$0xff] }
  0x18   :  { %853 = vmatpush.bf16.msra.mxu2 %v6371_v22  ;;  %v6388_v10 = vld [vmem:[%s8769_s1 + $0x118] sm:$0xff]  ;;  %v6387_v14 = vld [vmem:[%s8769_s1 + $0x110] sm:$0xff]  ;;  %v6410_v17 = vld [vmem:[%s8769_s1 + $0x1c8] sm:$0xff] }
  0x19   :  { %881 = vmatpush.bf16.msra.mxu3 %v6379_v23  ;;  %v6396_v11 = vld [vmem:[%s8769_s1 + $0x158] sm:$0xff]  ;;  %v6395_v15 = vld [vmem:[%s8769_s1 + $0x150] sm:$0xff]  ;;  %v6386_v18 = vld [vmem:[%s8769_s1 + $0x108] sm:$0xff] }
  0x1a   :  { %798 = vmatpush.bf16.msra.mxu0 %v6354_v24  ;;  %v6394_v19 = vld [vmem:[%s8769_s1 + $0x148] sm:$0xff]  ;;  %v4258_v20 = vld [vmem:[%s8770_s0 + $0x90] sm:$0xf]  ;;  %v6401_v21 = vld [vmem:[%s8769_s1 + $0x180] sm:$0xff] }
  0x1b   :  { %826 = vmatpush.bf16.msra.mxu1 %v6362_v25  ;;  %v6409_v22 = vld [vmem:[%s8769_s1 + $0x1c0] sm:$0xff]  ;;  %v6348_v23 = vld [vmem:[%s8770_s0 + $0xb0] sm:$0xf0]  ;;  %v4260_v25 = vld [vmem:[%s8770_s0 + $0xb4] sm:$0xf0] }
  0x1c   :  { %854 = vmatpush.bf16.msra.mxu2 %v6370_v26  ;;  %v6344_v24 = vld [vmem:[%s8770_s0 + $0x94] sm:$0xf]  ;;  %v4266_v26 = vld [vmem:[%s8770_s0 + $0x98] sm:$0xf]  ;;  %v4259_v32 = vor.u32 %v6348_v23, %v4258_v20  ;;  %v6422_v56 = vld [vmem:[%s8769_s1 + $0x228] sm:$0xff] }
  0x1d   :  { %882 = vmatpush.bf16.msra.mxu3 %v6378_v27  ;;  %v6349_v27 = vld [vmem:[%s8770_s0 + $0xb8] sm:$0xf0]  ;;  %v4263_v33 = vor.u32 %v6344_v24, %v4260_v25  ;;  %v6472_v59 = vld [vmem:[%s8769_s1 + $0x2e0] sm:$0xff]  ;;  %v4202_v62 = vld [vmem:[%s8770_s0 + $0x10] sm:$0xf] }
  0x1e   :  { %799 = vmatpush.bf16.msra.mxu0 %v6353_v28  ;;  %v6345_v28 = vld [vmem:[%s8770_s0 + $0x9c] sm:$0xf]  ;;  %v4267_v34 = vor.u32 %v6349_v27, %v4266_v26  ;;  %v6421_v60 = vld [vmem:[%s8769_s1 + $0x220] sm:$0xff]  ;;  %v6332_v63 = vld [vmem:[%s8770_s0 + $0x30] sm:$0xf0] }
  0x1f   :  { %827 = vmatpush.bf16.msra.mxu1 %v6361_v29  ;;  %v4268_v29 = vld [vmem:[%s8770_s0 + $0xbc] sm:$0xf0]  ;;  %v6467_v36 = vld [vmem:[%s8769_s1 + $0x2b8] sm:$0xff]  ;;  %v6328_v0 = vld [vmem:[%s8770_s0 + $0x14] sm:$0xf] }
  0x20   :  { %855 = vmatpush.bf16.msra.mxu2 %v6369_v30  ;;  %v6385_v30 = vld [vmem:[%s8769_s1 + $0x100] sm:$0xff]  ;;  %v4271_v35 = vor.u32 %v6345_v28, %v4268_v29  ;;  %v6475_v37 = vld [vmem:[%s8769_s1 + $0x2f8] sm:$0xff]  ;;  %v4248_v25 = vld [vmem:[%s8770_s0 + $0x84] sm:$0xf0] }
  0x21   :  { %883 = vmatpush.bf16.msra.mxu3 %v6377_v31  ;;  %800 = vmatmul.bf16.vlgmr.msra.gmra.mxu0 %v4187_v42  ;;  %v6393_v31 = vld [vmem:[%s8769_s1 + $0x140] sm:$0xff]  ;;  %v6424_v38 = vld [vmem:[%s8769_s1 + $0x238] sm:$0xff]  ;;  %v6423_v42 = vld [vmem:[%s8769_s1 + $0x230] sm:$0xff] }
  0x22   :  { %828 = vmatmul.bf16.vlgmr.msra.gmra.mxu1 %v4191_v43  ;;  %904 = vmatpush.bf16.msrb.mxu0 %v6392_v46  ;;  %v6459_v39 = vld [vmem:[%s8769_s1 + $0x278] sm:$0xff]  ;;  %v6458_v43 = vld [vmem:[%s8769_s1 + $0x270] sm:$0xff]  ;;  %v6456_v61 = vld [vmem:[%s8769_s1 + $0x260] sm:$0xff] }
  0x23   :  { %856 = vmatmul.bf16.vlgmr.msra.gmra.mxu2 %v4195_v44  ;;  %932 = vmatpush.bf16.msrb.mxu1 %v6400_v47  ;;  %v41_v44 = vld [vmem:[%s8770_s0 + $0xd8] sm:$0xff]  ;;  %v6342_v23 = vld [vmem:[%s8770_s0 + $0x80] sm:$0xf0] }
  0x24   :  { %960 = vmatpush.bf16.msrb.mxu2 %v6408_v40  ;;  %884 = vmatmul.bf16.vlgmr.msra.gmra.mxu3 %v4199_v45  ;;  %v6466_v40 = vld [vmem:[%s8769_s1 + $0x2b0] sm:$0xff]  ;;  %v42_v45 = vld [vmem:[%s8770_s0 + $0xe0] sm:$0xff]  ;;  %v279_v46 = vunpack.c.l.b16 %v41_v44  ;;  %v280_v47 = vunpack.c.h.b16 %v41_v44  ;;  %v4204_v1 = vld [vmem:[%s8770_s0 + $0x34] sm:$0xf0] }
  0x25   :  { %988 = vmatpush.bf16.msrb.mxu3 %v6416_v41  ;;  %v6474_v41 = vld [vmem:[%s8769_s1 + $0x2f0] sm:$0xff]  ;;  %v6337_v20 = vld [vmem:[%s8770_s0 + $0x5c] sm:$0xf]  ;;  %v6338_v24 = vld [vmem:[%s8770_s0 + $0x64] sm:$0xf] }
  0x26   :  { %905 = vmatpush.bf16.msrb.mxu0 %v6391_v50  ;;  %v315_v50 = vpack.c.b16 %v279_v46, %v279_v46  ;;  %v4251_v29 = vor.u32 %v6338_v24, %v4248_v25  ;;  %v6417_v46 = vld [vmem:[%s8769_s1 + $0x200] sm:$0xff] }
  0x27   :  { %933 = vmatpush.bf16.msrb.mxu1 %v6399_v51  ;;  %v316_v51 = vpack.c.b16 %v280_v47, %v280_v47  ;;  %v6452_v47 = vld [vmem:[%s8769_s1 + $0x240] sm:$0xff] }
  0x28   :  { %961 = vmatpush.bf16.msrb.mxu2 %v6407_v48  ;;  %v281_v48 = vunpack.c.l.b16 %v42_v45  ;;  %v6480_v25 = vld [vmem:[%s8769_s1 + $0x320] sm:$0xff] }
  0x29   :  { %989 = vmatpush.bf16.msrb.mxu3 %v6415_v49  ;;  %v282_v49 = vunpack.c.h.b16 %v42_v45 }
  0x2a   :  { %906 = vmatpush.bf16.msrb.mxu0 %v6390_v54  ;;  %v6465_v54 = vld [vmem:[%s8769_s1 + $0x2a8] sm:$0xff] }
  0x2b   :  { %934 = vmatpush.bf16.msrb.mxu1 %v6398_v55  ;;  %v6473_v55 = vld [vmem:[%s8769_s1 + $0x2e8] sm:$0xff] }
  0x2c   :  { %962 = vmatpush.bf16.msrb.mxu2 %v6406_v52  ;;  %v317_v52 = vpack.c.b16 %v281_v48, %v281_v48 }
  0x2d   :  { %990 = vmatpush.bf16.msrb.mxu3 %v6414_v53  ;;  %v318_v53 = vpack.c.b16 %v282_v49, %v282_v49 }
  0x2e   :  { %907 = vmatpush.bf16.msrb.mxu0 %v6389_v2  ;;  %v4210_v2 = vld [vmem:[%s8770_s0 + $0x18] sm:$0xf] }
  0x2f   :  { %935 = vmatpush.bf16.msrb.mxu1 %v6397_v3  ;;  %v6333_v3 = vld [vmem:[%s8770_s0 + $0x38] sm:$0xf0] }
  0x30   :  { %963 = vmatpush.bf16.msrb.mxu2 %v6405_v57  ;;  %v6457_v57 = vld [vmem:[%s8769_s1 + $0x268] sm:$0xff] }
  0x31   :  { %991 = vmatpush.bf16.msrb.mxu3 %v6413_v58  ;;  %805 = vmatmul.bf16.gmra.mxu0 %v4223_v6  ;;  %v6464_v58 = vld [vmem:[%s8769_s1 + $0x2a0] sm:$0xff]  ;;  %v4203_v6 = vor.u32 %v6332_v63, %v4202_v62 }
  0x32   :  { %833 = vmatmul.bf16.gmra.mxu1 %v4227_v7  ;;  %908 = vmatpush.bf16.msrb.mxu0 %v6388_v10  ;;  %v4207_v7 = vor.u32 %v6328_v0, %v4204_v1  ;;  %v6463_v10 = vld [vmem:[%s8769_s1 + $0x298] sm:$0xff] }
  0x33   :  { %861 = vmatmul.bf16.gmra.mxu2 %v4231_v8  ;;  %936 = vmatpush.bf16.msrb.mxu1 %v6396_v11  ;;  %v4211_v8 = vor.u32 %v6333_v3, %v4210_v2  ;;  %v6471_v11 = vld [vmem:[%s8769_s1 + $0x2d8] sm:$0xff]  ;;  %v6482_v2 = vld [vmem:[%s8769_s1 + $0x330] sm:$0xff] }
  0x34   :  { %964 = vmatpush.bf16.msrb.mxu2 %v6404_v4  ;;  %889 = vmatmul.bf16.gmra.mxu3 %v4235_v9  ;;  %v6329_v4 = vld [vmem:[%s8770_s0 + $0x1c] sm:$0xf]  ;;  %v6490_v3 = vld [vmem:[%s8769_s1 + $0x370] sm:$0xff] }
  0x35   :  { %992 = vmatpush.bf16.msrb.mxu3 %v6412_v5  ;;  %v4212_v5 = vld [vmem:[%s8770_s0 + $0x3c] sm:$0xf0] }
  0x36   :  { %909 = vmatpush.bf16.msrb.mxu0 %v6387_v14  ;;  %v4215_v9 = vor.u32 %v6329_v4, %v4212_v5  ;;  %v6462_v14 = vld [vmem:[%s8769_s1 + $0x290] sm:$0xff]  ;;  %v6497_v4 = vld [vmem:[%s8769_s1 + $0x3a8] sm:$0xff] }
  0x37   :  { %937 = vmatpush.bf16.msrb.mxu1 %v6395_v15  ;;  %v6470_v15 = vld [vmem:[%s8769_s1 + $0x2d0] sm:$0xff]  ;;  %v6505_v5 = vld [vmem:[%s8769_s1 + $0x3e8] sm:$0xff] }
  0x38   :  { %965 = vmatpush.bf16.msrb.mxu2 %v6403_v12  ;;  %v6420_v12 = vld [vmem:[%s8769_s1 + $0x218] sm:$0xff] }
  0x39   :  { %993 = vmatpush.bf16.msrb.mxu3 %v6411_v13  ;;  %v6455_v13 = vld [vmem:[%s8769_s1 + $0x258] sm:$0xff] }
  0x3a   :  { %910 = vmatpush.bf16.msrb.mxu0 %v6386_v18  ;;  %v4238_v18 = vld [vmem:[%s8770_s0 + $0x58] sm:$0xf] }
  0x3b   :  { %938 = vmatpush.bf16.msrb.mxu1 %v6394_v19  ;;  %v6341_v19 = vld [vmem:[%s8770_s0 + $0x78] sm:$0xf0] }
  0x3c   :  { %966 = vmatpush.bf16.msrb.mxu2 %v6402_v16  ;;  %v6419_v16 = vld [vmem:[%s8769_s1 + $0x210] sm:$0xff]  ;;  %v4239_v26 = vor.u32 %v6341_v19, %v4238_v18 }
  0x3d   :  { %994 = vmatpush.bf16.msrb.mxu3 %v6410_v17  ;;  %v6454_v17 = vld [vmem:[%s8769_s1 + $0x250] sm:$0xff] }
  0x3e   :  { %911 = vmatpush.bf16.msrb.mxu0 %v6385_v30  ;;  %v6461_v30 = vld [vmem:[%s8769_s1 + $0x288] sm:$0xff] }
  0x3f   :  { %939 = vmatpush.bf16.msrb.mxu1 %v6393_v31  ;;  %v6469_v31 = vld [vmem:[%s8769_s1 + $0x2c8] sm:$0xff] }
  0x40   :  { %967 = vmatpush.bf16.msrb.mxu2 %v6401_v21  ;;  %v4240_v21 = vld [vmem:[%s8770_s0 + $0x7c] sm:$0xf0] }
  0x41   :  { %995 = vmatpush.bf16.msrb.mxu3 %v6409_v22  ;;  %810 = vmatmul.bf16.gmra.mxu0 %v4259_v32  ;;  %v4246_v22 = vld [vmem:[%s8770_s0 + $0x60] sm:$0xf]  ;;  %v4243_v27 = vor.u32 %v6337_v20, %v4240_v21  ;;  %v6418_v32 = vld [vmem:[%s8769_s1 + $0x208] sm:$0xff] }
  0x42   :  { %838 = vmatmul.bf16.gmra.mxu1 %v4263_v33  ;;  %1016 = vmatpush.bf16.msra.mxu0 %v6424_v38  ;;  %v4247_v28 = vor.u32 %v6342_v23, %v4246_v22  ;;  %v6453_v33 = vld [vmem:[%s8769_s1 + $0x248] sm:$0xff]  ;;  %v6346_v38 = vld [vmem:[%s8770_s0 + $0xa4] sm:$0xf] }
  0x43   :  { %866 = vmatmul.bf16.gmra.mxu2 %v4267_v34  ;;  %1834 = vmatpush.bf16.msra.mxu1 %v6459_v39  ;;  %v6460_v34 = vld [vmem:[%s8769_s1 + $0x280] sm:$0xff]  ;;  %v4276_v39 = vld [vmem:[%s8770_s0 + $0xc4] sm:$0xf0] }
  0x44   :  { %894 = vmatmul.bf16.gmra.mxu3 %v4271_v35  ;;  %1862 = vmatpush.bf16.msra.mxu2 %v6467_v36  ;;  %v6468_v35 = vld [vmem:[%s8769_s1 + $0x2c0] sm:$0xff]  ;;  %v4279_v45 = vor.u32 %v6346_v38, %v4276_v39  ;;  %v6494_v38 = vld [vmem:[%s8769_s1 + $0x390] sm:$0xff]  ;;  %v4254_v39 = vld [vmem:[%s8770_s0 + $0x68] sm:$0xf] }
  0x45   :  { %1890 = vmatpush.bf16.msra.mxu3 %v6475_v37  ;;  %v4274_v36 = vld [vmem:[%s8770_s0 + $0xa0] sm:$0xf]  ;;  %v6350_v37 = vld [vmem:[%s8770_s0 + $0xc0] sm:$0xf0] }
  0x46   :  { %1017 = vmatpush.bf16.msra.mxu0 %v6423_v42  ;;  %v6347_v42 = vld [vmem:[%s8770_s0 + $0xac] sm:$0xf]  ;;  %v4275_v44 = vor.u32 %v6350_v37, %v4274_v36  ;;  %v6479_v36 = vld [vmem:[%s8769_s1 + $0x318] sm:$0xff] }
  0x47   :  { %1835 = vmatpush.bf16.msra.mxu1 %v6458_v43  ;;  %v4284_v43 = vld [vmem:[%s8770_s0 + $0xcc] sm:$0xf0]  ;;  %v6487_v37 = vld [vmem:[%s8769_s1 + $0x358] sm:$0xff] }
  0x48   :  { %1863 = vmatpush.bf16.msra.mxu2 %v6466_v40  ;;  %v4282_v40 = vld [vmem:[%s8770_s0 + $0xa8] sm:$0xf]  ;;  %v4287_v49 = vor.u32 %v6347_v42, %v4284_v43  ;;  %v4797_v42 = vld [vmem:[%s8770_s0 + $0x144] sm:$0xf] }
  0x49   :  { %1891 = vmatpush.bf16.msra.mxu3 %v6474_v41  ;;  %v6351_v41 = vld [vmem:[%s8770_s0 + $0xc8] sm:$0xf0]  ;;  %v6438_v43 = vld [vmem:[%s8770_s0 + $0x164] sm:$0xf0] }
  0x4a   :  { %1018 = vmatpush.bf16.msra.mxu0 %v6422_v56  ;;  %v4283_v48 = vor.u32 %v6351_v41, %v4282_v40  ;;  %v6498_v56 = vld [vmem:[%s8769_s1 + $0x3b0] sm:$0xff]  ;;  %v6343_v40 = vld [vmem:[%s8770_s0 + $0x88] sm:$0xf0] }
  0x4b   :  { %1836 = vmatpush.bf16.msra.mxu1 %v6457_v57  ;;  %v6502_v41 = vld [vmem:[%s8769_s1 + $0x3d0] sm:$0xff] }
  0x4c   :  { %1864 = vmatpush.bf16.msra.mxu2 %v6465_v54  ;;  %v6483_v54 = vld [vmem:[%s8769_s1 + $0x338] sm:$0xff] }
  0x4d   :  { %1892 = vmatpush.bf16.msra.mxu3 %v6473_v55  ;;  %v6491_v55 = vld [vmem:[%s8769_s1 + $0x378] sm:$0xff] }
  0x4e   :  { %1019 = vmatpush.bf16.msra.mxu0 %v6421_v60 }
  0x4f   :  { %1837 = vmatpush.bf16.msra.mxu1 %v6456_v61 }
  0x50   :  { %1865 = vmatpush.bf16.msra.mxu2 %v6464_v58 }
  0x51   :  { %815 = vmatmul.bf16.gmra.mxu0 %v315_v50  ;;  %1893 = vmatpush.bf16.msra.mxu3 %v6472_v59  ;;  %v6499_v50 = vld [vmem:[%s8769_s1 + $0x3b8] sm:$0xff]  ;;  %v6506_v59 = vld [vmem:[%s8769_s1 + $0x3f0] sm:$0xff] }
  0x52   :  { %843 = vmatmul.bf16.gmra.mxu1 %v316_v51  ;;  %1020 = vmatpush.bf16.msra.mxu0 %v6420_v12  ;;  %v6507_v51 = vld [vmem:[%s8769_s1 + $0x3f8] sm:$0xff] }
  0x53   :  { %871 = vmatmul.bf16.gmra.mxu2 %v317_v52  ;;  %1838 = vmatpush.bf16.msra.mxu1 %v6455_v13  ;;  %v43_v52 = vld [vmem:[%s8770_s0 + $0xe8] sm:$0xff]  ;;  %v4761_v12 = vld [vmem:[%s8770_s0 + $0xfc] sm:$0xf]  ;;  %v6429_v13 = vld [vmem:[%s8770_s0 + $0x11c] sm:$0xf0] }
  0x54   :  { %899 = vmatmul.bf16.gmra.mxu3 %v318_v53  ;;  %1866 = vmatpush.bf16.msra.mxu2 %v6463_v10  ;;  %v44_v53 = vld [vmem:[%s8770_s0 + $0xf0] sm:$0xff]  ;;  %v283_v57 = vunpack.c.l.b16 %v43_v52  ;;  %v284_v58 = vunpack.c.h.b16 %v43_v52  ;;  %v6334_v10 = vld [vmem:[%s8770_s0 + $0x40] sm:$0xf0]  ;;  %v4762_v19 = vor.u32 %v6429_v13, %v4761_v12  ;;  %v4833_v12 = vld [vmem:[%s8770_s0 + $0x18c] sm:$0xf] }
  0x55   :  { %1894 = vmatpush.bf16.msra.mxu3 %v6471_v11  ;;  %v285_v60 = vunpack.c.l.b16 %v44_v53  ;;  %v286_v61 = vunpack.c.h.b16 %v44_v53  ;;  %v6504_v11 = vld [vmem:[%s8769_s1 + $0x3e0] sm:$0xff]  ;;  %v6447_v13 = vld [vmem:[%s8770_s0 + $0x1ac] sm:$0xf0] }
  0x56   :  { %1021 = vmatpush.bf16.msra.mxu0 %v6419_v16  ;;  %v319_v62 = vpack.c.b16 %v283_v57, %v283_v57  ;;  %v320_v63 = vpack.c.b16 %v284_v58, %v284_v58  ;;  %v4769_v16 = vld [vmem:[%s8770_s0 + $0x104] sm:$0xf] }
  0x57   :  { %1839 = vmatpush.bf16.msra.mxu1 %v6454_v17  ;;  %v321_v0 = vpack.c.b16 %v285_v60, %v285_v60  ;;  %v322_v1 = vpack.c.b16 %v286_v61, %v286_v61  ;;  %v6430_v17 = vld [vmem:[%s8770_s0 + $0x124] sm:$0xf0]  ;;  %v6486_v60 = vld [vmem:[%s8769_s1 + $0x350] sm:$0xff] }
  0x58   :  { %1867 = vmatpush.bf16.msra.mxu2 %v6462_v14  ;;  %v6425_v14 = vld [vmem:[%s8770_s0 + $0x100] sm:$0xf]  ;;  %v4770_v23 = vor.u32 %v6430_v17, %v4769_v16  ;;  %v6493_v61 = vld [vmem:[%s8769_s1 + $0x388] sm:$0xff]  ;;  %v4841_v16 = vld [vmem:[%s8770_s0 + $0x194] sm:$0xf] }
  0x59   :  { %1895 = vmatpush.bf16.msra.mxu3 %v6470_v15  ;;  %v4763_v15 = vld [vmem:[%s8770_s0 + $0x120] sm:$0xf0]  ;;  %v6448_v17 = vld [vmem:[%s8770_s0 + $0x1b4] sm:$0xf0] }
  0x5a   :  { %1022 = vmatpush.bf16.msra.mxu0 %v6418_v32  ;;  %v4766_v22 = vor.u32 %v6425_v14, %v4763_v15  ;;  %v6443_v14 = vld [vmem:[%s8770_s0 + $0x190] sm:$0xf]  ;;  %v4835_v15 = vld [vmem:[%s8770_s0 + $0x1b0] sm:$0xf0] }
  0x5b   :  { %1840 = vmatpush.bf16.msra.mxu1 %v6453_v33 }
  0x5c   :  { %1868 = vmatpush.bf16.msra.mxu2 %v6461_v30 }
  0x5d   :  { %1896 = vmatpush.bf16.msra.mxu3 %v6469_v31 }
  0x5e   :  { %1023 = vmatpush.bf16.msra.mxu0 %v6417_v46  ;;  %v4805_v46 = vld [vmem:[%s8770_s0 + $0x14c] sm:$0xf] }
  0x5f   :  { %1841 = vmatpush.bf16.msra.mxu1 %v6452_v47  ;;  %v6439_v47 = vld [vmem:[%s8770_s0 + $0x16c] sm:$0xf0] }
  0x60   :  { %1869 = vmatpush.bf16.msra.mxu2 %v6460_v34 }
  0x61   :  { %912 = vmatmul.bf16.vlgmr.msrb.gmra.mxu0 %v4203_v6  ;;  %1897 = vmatpush.bf16.msra.mxu3 %v6468_v35  ;;  %v6481_v6 = vld [vmem:[%s8769_s1 + $0x328] sm:$0xff] }
  0x62   :  { %940 = vmatmul.bf16.vlgmr.msrb.gmra.mxu1 %v4207_v7  ;;  %1918 = vmatpush.bf16.msrb.mxu0 %v6483_v54  ;;  %v6489_v7 = vld [vmem:[%s8769_s1 + $0x368] sm:$0xff] }
  0x63   :  { %968 = vmatmul.bf16.vlgmr.msrb.gmra.mxu2 %v4211_v8  ;;  %1946 = vmatpush.bf16.msrb.mxu1 %v6491_v55  ;;  %v6496_v8 = vld [vmem:[%s8769_s1 + $0x3a0] sm:$0xff] }
  0x64   :  { %996 = vmatmul.bf16.vlgmr.msrb.gmra.mxu3 %v4215_v9  ;;  %1974 = vmatpush.bf16.msrb.mxu2 %v6499_v50  ;;  %v4218_v9 = vld [vmem:[%s8770_s0 + $0x20] sm:$0xf]  ;;  %v4255_v50 = vor.u32 %v6343_v40, %v4254_v39  ;;  %v45_v39 = vld [vmem:[%s8770_s0 + $0xf8] sm:$0xf] }
  0x65   :  { %2002 = vmatpush.bf16.msrb.mxu3 %v6507_v51  ;;  %v4219_v18 = vor.u32 %v6334_v10, %v4218_v9  ;;  %v4798_v51 = vor.u32 %v6438_v43, %v4797_v42  ;;  %v4290_v9 = vld [vmem:[%s8770_s0 + $0xb0] sm:$0xf]  ;;  %v6352_v10 = vld [vmem:[%s8770_s0 + $0xd0] sm:$0xf0]  ;;  %v7372_v42 = vld [vmem:[%s8770_s0 + $0x1dc] sm:$0xff] }
  0x66   :  { %1919 = vmatpush.bf16.msrb.mxu0 %v6482_v2  ;;  %v4610_v40 = vld [vmem:[%s8770_s0 + $0x1d4] sm:$0xff] }
  0x67   :  { %1947 = vmatpush.bf16.msrb.mxu1 %v6490_v3 }
  0x68   :  { %1975 = vmatpush.bf16.msrb.mxu2 %v6498_v56  ;;  %v4806_v56 = vor.u32 %v6439_v47, %v4805_v46  ;;  %v6515_v46 = vld [vmem:[%s8769_s1 + $0x438] sm:$0xff] }
  0x69   :  { %2003 = vmatpush.bf16.msrb.mxu3 %v6506_v59  ;;  %v6478_v59 = vld [vmem:[%s8769_s1 + $0x310] sm:$0xff]  ;;  %v6523_v47 = vld [vmem:[%s8769_s1 + $0x478] sm:$0xff] }
  0x6a   :  { %1920 = vmatpush.bf16.msrb.mxu0 %v6481_v6  ;;  %v6477_v6 = vld [vmem:[%s8769_s1 + $0x308] sm:$0xff] }
  0x6b   :  { %1948 = vmatpush.bf16.msrb.mxu1 %v6489_v7  ;;  %v6485_v7 = vld [vmem:[%s8769_s1 + $0x348] sm:$0xff] }
  0x6c   :  { %1976 = vmatpush.bf16.msrb.mxu2 %v6497_v4 }
  0x6d   :  { %2004 = vmatpush.bf16.msrb.mxu3 %v6505_v5 }
  0x6e   :  { %1921 = vmatpush.bf16.msrb.mxu0 %v6480_v25 }
  0x70   :  { %1977 = vmatpush.bf16.msrb.mxu2 %v6496_v8  ;;  %v6492_v8 = vld [vmem:[%s8769_s1 + $0x380] sm:$0xff] }
  0x71   :  { %917 = vmatmul.bf16.gmra.mxu0 %v4239_v26  ;;  %2005 = vmatpush.bf16.msrb.mxu3 %v6504_v11  ;;  %v6488_v26 = vld [vmem:[%s8769_s1 + $0x360] sm:$0xff] }
  0x72   :  { %945 = vmatmul.bf16.gmra.mxu1 %v4243_v27  ;;  %v6495_v27 = vld [vmem:[%s8769_s1 + $0x398] sm:$0xff]  ;;  %1922 = vmatpush.bf16.msrb.mxu0 %v6479_v36  ;;  %v6500_v11 = vld [vmem:[%s8769_s1 + $0x3c0] sm:$0xff] }
  0x73   :  { %973 = vmatmul.bf16.gmra.mxu2 %v4247_v28  ;;  %v6503_v28 = vld [vmem:[%s8769_s1 + $0x3d8] sm:$0xff]  ;;  %1949 = vmatpush.bf16.msrb.mxu1 %v6488_v26 }
  0x74   :  { %1001 = vmatmul.bf16.gmra.mxu3 %v4251_v29  ;;  %1978 = vmatpush.bf16.msrb.mxu2 %v6495_v27  ;;  %v4838_v27 = vor.u32 %v6443_v14, %v4835_v15  ;;  %v6513_v14 = vld [vmem:[%s8769_s1 + $0x428] sm:$0xff] }
  0x75   :  { %2006 = vmatpush.bf16.msrb.mxu3 %v6503_v28  ;;  %v4842_v28 = vor.u32 %v6448_v17, %v4841_v16  ;;  %v6521_v15 = vld [vmem:[%s8769_s1 + $0x468] sm:$0xff]  ;;  %v6555_v16 = vld [vmem:[%s8769_s1 + $0x4a0] sm:$0xff]  ;;  %v6431_v17 = vld [vmem:[%s8770_s0 + $0x12c] sm:$0xf0] }
  0x76   :  { %1923 = vmatpush.bf16.msrb.mxu0 %v6478_v59 }
  0x77   :  { %1950 = vmatpush.bf16.msrb.mxu1 %v6487_v37 }
  0x78   :  { %1979 = vmatpush.bf16.msrb.mxu2 %v6494_v38 }
  0x79   :  { %2007 = vmatpush.bf16.msrb.mxu3 %v6502_v41 }
  0x7a   :  { %1924 = vmatpush.bf16.msrb.mxu0 %v6477_v6 }
  0x7b   :  { %1951 = vmatpush.bf16.msrb.mxu1 %v6486_v60 }
  0x7c   :  { %1980 = vmatpush.bf16.msrb.mxu2 %v6493_v61 }
  0x7f   :  { %1952 = vmatpush.bf16.msrb.mxu1 %v6485_v7 }
  0x80   :  { %1981 = vmatpush.bf16.msrb.mxu2 %v6492_v8 }
  0x81   :  { %922 = vmatmul.bf16.gmra.mxu0 %v4275_v44  ;;  %v6434_v44 = vld [vmem:[%s8770_s0 + $0x148] sm:$0xf] }
  0x82   :  { %950 = vmatmul.bf16.gmra.mxu1 %v4279_v45  ;;  %v4799_v45 = vld [vmem:[%s8770_s0 + $0x168] sm:$0xf0] }
  0x83   :  { %978 = vmatmul.bf16.gmra.mxu2 %v4283_v48  ;;  %v4802_v55 = vor.u32 %v6434_v44, %v4799_v45  ;;  %v287_v44 = vunpack.c.l.b16 %v45_v39  ;;  %v1321_v45 = vunpack.c.l.b16 %v4610_v40 }
  0x84   :  { %1006 = vmatmul.bf16.gmra.mxu3 %v4287_v49 }
  0x91   :  { %927 = vmatmul.bf16.gmra.mxu0 %v319_v62  ;;  %v6501_v62 = vld [vmem:[%s8769_s1 + $0x3c8] sm:$0xff] }
  0x92   :  { %955 = vmatmul.bf16.gmra.mxu1 %v320_v63  ;;  %2008 = vmatpush.bf16.msrb.mxu3 %v6501_v62 }
  0x93   :  { %983 = vmatmul.bf16.gmra.mxu2 %v321_v0 }
  0x94   :  { %1011 = vmatmul.bf16.gmra.mxu3 %v322_v1 }
  0x96   :  { %2009 = vmatpush.bf16.msrb.mxu3 %v6500_v11  ;;  %v6426_v11 = vld [vmem:[%s8770_s0 + $0x108] sm:$0xf] }
  0x9e   :  { %v801_v20 = vpop.f32.mrf.mxu0 }
  0x9f   :  { %v829_v21 = vpop.f32.mrf.mxu1 }
  0xa0   :  { %v830_v24 = vadd.f32 %v829_v21, %v801_v20  ;;  %v4291_v20 = vor.u32 %v6352_v10, %v4290_v9  ;;  %v4834_v21 = vor.u32 %v6447_v13, %v4833_v12  ;;  %v4771_v12 = vld [vmem:[%s8770_s0 + $0x128] sm:$0xf0] }
  0xa1   :  { %1024 = vmatmul.bf16.vlgmr.msra.gmra.mxu0 %v4219_v18  ;;  %v4777_v13 = vld [vmem:[%s8770_s0 + $0x10c] sm:$0xf] }
  0xa2   :  { %1842 = vmatmul.bf16.vlgmr.msra.gmra.mxu1 %v4762_v19 }
  0xa3   :  { %1870 = vmatmul.bf16.vlgmr.msra.gmra.mxu2 %v4766_v22  ;;  %v6476_v22 = vld [vmem:[%s8769_s1 + $0x300] sm:$0xff] }
  0xa4   :  { %1898 = vmatmul.bf16.vlgmr.msra.gmra.mxu3 %v4770_v23  ;;  %v6484_v23 = vld [vmem:[%s8769_s1 + $0x340] sm:$0xff]  ;;  %1925 = vmatpush.bf16.msrb.mxu0 %v6476_v22  ;;  %v6432_v22 = vld [vmem:[%s8770_s0 + $0x134] sm:$0xf0] }
  0xa5   :  { %1953 = vmatpush.bf16.msrb.mxu1 %v6484_v23 }
  0xa6   :  { %v857_v29 = vpop.f32.mrf.mxu2  ;;  %v803_v32 = vpop.f32.mrf.mxu0 }
  0xa7   :  { %v885_v30 = vpop.f32.mrf.mxu3  ;;  %v858_v31 = vadd.f32 %v857_v29, %v830_v24  ;;  %v831_v33 = vpop.f32.mrf.mxu1 }
  0xa8   :  { %v832_v34 = vadd.f32 %v831_v33, %v803_v32  ;;  %v6566_v32 = vld [vmem:[%s8769_s1 + $0x4f8] sm:$0xff]  ;;  %2030 = vmatpush.bf16.msra.mxu0 %v6515_v46 }
  0xa9   :  { %v7259_v35 = vadd.f32 %v885_v30, %v858_v31  ;;  %v6558_v31 = vld [vmem:[%s8769_s1 + $0x4b8] sm:$0xff]  ;;  %2905 = vmatpush.bf16.msra.mxu3 %v6566_v32  ;;  %2058 = vmatpush.bf16.msra.mxu1 %v6523_v47  ;;  %v6512_v32 = vld [vmem:[%s8769_s1 + $0x420] sm:$0xff] }
  0xaa   :  { %2877 = vmatpush.bf16.msra.mxu2 %v6558_v31  ;;  %v6511_v46 = vld [vmem:[%s8769_s1 + $0x418] sm:$0xff] }
  0xab   :  { %v6519_v47 = vld [vmem:[%s8769_s1 + $0x458] sm:$0xff] }
  0xae   :  { %v859_v48 = vpop.f32.mrf.mxu2  ;;  %v806_v53 = vpop.f32.mrf.mxu0 }
  0xaf   :  { %v887_v49 = vpop.f32.mrf.mxu3  ;;  %v860_v52 = vadd.f32 %v859_v48, %v832_v34  ;;  %v834_v54 = vpop.f32.mrf.mxu1  ;;  %v6557_v48 = vld [vmem:[%s8769_s1 + $0x4b0] sm:$0xff] }
  0xb0   :  { %v835_v57 = vadd.f32 %v834_v54, %v806_v53  ;;  %2878 = vmatpush.bf16.msra.mxu2 %v6557_v48  ;;  %v323_v54 = vpack.c.b16 %v287_v44, %v287_v44  ;;  %v4807_v44 = vld [vmem:[%s8770_s0 + $0x170] sm:$0xf0] }
  0xb1   :  { %v7297_v58 = vadd.f32 %v887_v49, %v860_v52  ;;  %1029 = vmatmul.bf16.gmra.mxu0 %v4255_v50  ;;  %v1322_v49 = vunpack.c.h.b16 %v4610_v40  ;;  %v1323_v50 = vunpack.c.l.b16 %v7372_v42  ;;  %v6553_v48 = vld [vmem:[%s8769_s1 + $0x490] sm:$0xff] }
  0xb2   :  { %1847 = vmatmul.bf16.gmra.mxu1 %v4798_v51  ;;  %v6565_v51 = vld [vmem:[%s8769_s1 + $0x4f0] sm:$0xff] }
  0xb3   :  { %1875 = vmatmul.bf16.gmra.mxu2 %v4802_v55  ;;  %2906 = vmatpush.bf16.msra.mxu3 %v6565_v51  ;;  %v1357_v55 = vpack.c.b16 %v1321_v45, %v1321_v45  ;;  %v1358_v60 = vpack.c.b16 %v1322_v49, %v1322_v49  ;;  %v1359_v61 = vpack.c.b16 %v1323_v50, %v1323_v50  ;;  %v4813_v45 = vld [vmem:[%s8770_s0 + $0x154] sm:$0xf]  ;;  %v6440_v49 = vld [vmem:[%s8770_s0 + $0x174] sm:$0xf0] }
  0xb4   :  { %1903 = vmatmul.bf16.gmra.mxu3 %v4806_v56  ;;  %v6436_v50 = vld [vmem:[%s8770_s0 + $0x158] sm:$0xf]  ;;  %v6561_v51 = vld [vmem:[%s8769_s1 + $0x4d0] sm:$0xff] }
  0xb6   :  { %v862_v63 = vpop.f32.mrf.mxu2  ;;  %v808_v2 = vpop.f32.mrf.mxu0 }
  0xb7   :  { %v890_v0 = vpop.f32.mrf.mxu3  ;;  %v863_v1 = vadd.f32 %v862_v63, %v835_v57  ;;  %v836_v3 = vpop.f32.mrf.mxu1 }
  0xb8   :  { %v837_v4 = vadd.f32 %v836_v3, %v808_v2  ;;  %v6556_v2 = vld [vmem:[%s8769_s1 + $0x4a8] sm:$0xff] }
  0xb9   :  { %v7311_v5 = vadd.f32 %v890_v0, %v863_v1  ;;  %v6514_v0 = vld [vmem:[%s8769_s1 + $0x430] sm:$0xff]  ;;  %v6564_v3 = vld [vmem:[%s8769_s1 + $0x4e8] sm:$0xff]  ;;  %2879 = vmatpush.bf16.msra.mxu2 %v6556_v2 }
  0xba   :  { %v6522_v1 = vld [vmem:[%s8769_s1 + $0x470] sm:$0xff]  ;;  %2031 = vmatpush.bf16.msra.mxu0 %v6514_v0  ;;  %2907 = vmatpush.bf16.msra.mxu3 %v6564_v3  ;;  %v6552_v3 = vld [vmem:[%s8769_s1 + $0x488] sm:$0xff] }
  0xbb   :  { %2059 = vmatpush.bf16.msra.mxu1 %v6522_v1  ;;  %v6510_v1 = vld [vmem:[%s8769_s1 + $0x410] sm:$0xff] }
  0xbc   :  { %v6518_v2 = vld [vmem:[%s8769_s1 + $0x450] sm:$0xff] }
  0xbd   :  { %2880 = vmatpush.bf16.msra.mxu2 %v6555_v16  ;;  %v6559_v16 = vld [vmem:[%s8769_s1 + $0x4c0] sm:$0xff] }
  0xbe   :  { %v864_v18 = vpop.f32.mrf.mxu2  ;;  %v811_v25 = vpop.f32.mrf.mxu0  ;;  %2032 = vmatpush.bf16.msra.mxu0 %v6513_v14  ;;  %v6444_v14 = vld [vmem:[%s8770_s0 + $0x198] sm:$0xf] }
  0xbf   :  { %v892_v19 = vpop.f32.mrf.mxu3  ;;  %v865_v24 = vadd.f32 %v864_v18, %v837_v4  ;;  %v839_v26 = vpop.f32.mrf.mxu1  ;;  %v6427_v18 = vld [vmem:[%s8770_s0 + $0x110] sm:$0xf]  ;;  %2060 = vmatpush.bf16.msra.mxu1 %v6521_v15  ;;  %v4843_v15 = vld [vmem:[%s8770_s0 + $0x1b8] sm:$0xf0] }
  0xc0   :  { %v840_v29 = vadd.f32 %v839_v26, %v811_v25  ;;  %v4774_v25 = vor.u32 %v6426_v11, %v4771_v12  ;;  %v4778_v26 = vor.u32 %v6431_v17, %v4777_v13  ;;  %v6509_v11 = vld [vmem:[%s8769_s1 + $0x408] sm:$0xff]  ;;  %v6551_v13 = vld [vmem:[%s8769_s1 + $0x480] sm:$0xff]  ;;  %v4849_v17 = vld [vmem:[%s8770_s0 + $0x19c] sm:$0xf] }
  0xc1   :  { %v7355_v30 = vadd.f32 %v892_v19, %v865_v24  ;;  %1034 = vmatmul.bf16.gmra.mxu0 %v4291_v20  ;;  %v6563_v19 = vld [vmem:[%s8769_s1 + $0x4e0] sm:$0xff]  ;;  %v4779_v20 = vld [vmem:[%s8770_s0 + $0x130] sm:$0xf0]  ;;  %v6517_v12 = vld [vmem:[%s8769_s1 + $0x448] sm:$0xff] }
  0xc2   :  { %1852 = vmatmul.bf16.gmra.mxu1 %v4834_v21  ;;  %v4785_v21 = vld [vmem:[%s8770_s0 + $0x114] sm:$0xf]  ;;  %2908 = vmatpush.bf16.msra.mxu3 %v6563_v19  ;;  %v6445_v19 = vld [vmem:[%s8770_s0 + $0x1a0] sm:$0xf] }
  0xc3   :  { %1880 = vmatmul.bf16.gmra.mxu2 %v4838_v27  ;;  %v4786_v31 = vor.u32 %v6432_v22, %v4785_v21  ;;  %2033 = vmatpush.bf16.msra.mxu0 %v6512_v32  ;;  %v4857_v21 = vld [vmem:[%s8770_s0 + $0x1a4] sm:$0xf]  ;;  %v6450_v22 = vld [vmem:[%s8770_s0 + $0x1c4] sm:$0xf0] }
  0xc4   :  { %1908 = vmatmul.bf16.gmra.mxu3 %v4842_v28 }
  0xc6   :  { %v867_v33 = vpop.f32.mrf.mxu2  ;;  %v813_v37 = vpop.f32.mrf.mxu0 }
  0xc7   :  { %v895_v34 = vpop.f32.mrf.mxu3  ;;  %v868_v36 = vadd.f32 %v867_v33, %v840_v29  ;;  %v841_v38 = vpop.f32.mrf.mxu1  ;;  %v4782_v29 = vor.u32 %v6427_v18, %v4779_v20  ;;  %v6520_v33 = vld [vmem:[%s8769_s1 + $0x460] sm:$0xff]  ;;  %2034 = vmatpush.bf16.msra.mxu0 %v6511_v46 }
  0xc8   :  { %v842_v41 = vadd.f32 %v841_v38, %v813_v37  ;;  %2061 = vmatpush.bf16.msra.mxu1 %v6520_v33  ;;  %v6449_v18 = vld [vmem:[%s8770_s0 + $0x1bc] sm:$0xf0]  ;;  %v4851_v20 = vld [vmem:[%s8770_s0 + $0x1c0] sm:$0xf0] }
  0xc9   :  { %v7374_v43 = vadd.f32 %v895_v34, %v868_v36  ;;  %v6554_v34 = vld [vmem:[%s8769_s1 + $0x498] sm:$0xff] }
  0xca   :  { %v6562_v36 = vld [vmem:[%s8769_s1 + $0x4d8] sm:$0xff]  ;;  %2881 = vmatpush.bf16.msra.mxu2 %v6554_v34  ;;  %v4854_v34 = vor.u32 %v6445_v19, %v4851_v20 }
  0xcb   :  { %2909 = vmatpush.bf16.msra.mxu3 %v6562_v36  ;;  %2035 = vmatpush.bf16.msra.mxu0 %v6510_v1  ;;  %v4858_v36 = vor.u32 %v6450_v22, %v4857_v21 }
  0xcc   :  { %2062 = vmatpush.bf16.msra.mxu1 %v6519_v47 }
  0xce   :  { %v869_v52 = vpop.f32.mrf.mxu2  ;;  %v816_v57 = vpop.f32.mrf.mxu0  ;;  %2882 = vmatpush.bf16.msra.mxu2 %v6553_v48 }
  0xcf   :  { %v897_v53 = vpop.f32.mrf.mxu3  ;;  %v870_v56 = vadd.f32 %v869_v52, %v842_v41  ;;  %v844_v59 = vpop.f32.mrf.mxu1  ;;  %v6435_v41 = vld [vmem:[%s8770_s0 + $0x150] sm:$0xf]  ;;  %v4815_v52 = vld [vmem:[%s8770_s0 + $0x178] sm:$0xf0]  ;;  %2910 = vmatpush.bf16.msra.mxu3 %v6561_v51  ;;  %2036 = vmatpush.bf16.msra.mxu0 %v6509_v11  ;;  %v1324_v51 = vunpack.c.h.b16 %v7372_v42 }
  0xd0   :  { %v845_v62 = vadd.f32 %v844_v59, %v816_v57  ;;  %v4810_v57 = vor.u32 %v6435_v41, %v4807_v44  ;;  %v4814_v59 = vor.u32 %v6440_v49, %v4813_v45  ;;  %2063 = vmatpush.bf16.msra.mxu1 %v6518_v2  ;;  %v6590_v41 = vld [vmem:[%s8769_s1 + $0x5b8] sm:$0xff]  ;;  %v4612_v49 = vld [vmem:[%s8770_s0 + $0x1e4] sm:$0xff]  ;;  %v6597_v42 = vld [vmem:[%s8769_s1 + $0x5f0] sm:$0xff] }
  0xd1   :  { %v7389_v63 = vadd.f32 %v897_v53, %v870_v56  ;;  %1039 = vmatmul.bf16.gmra.mxu0 %v323_v54  ;;  %v4821_v53 = vld [vmem:[%s8770_s0 + $0x15c] sm:$0xf]  ;;  %v6441_v54 = vld [vmem:[%s8770_s0 + $0x17c] sm:$0xf0]  ;;  %v1360_v2 = vpack.c.b16 %v1324_v51, %v1324_v51 }
  0xd2   :  { %1857 = vmatmul.bf16.gmra.mxu1 %v1357_v55  ;;  %v4822_v0 = vor.u32 %v6441_v54, %v4821_v53  ;;  %2883 = vmatpush.bf16.msra.mxu2 %v6552_v3  ;;  %v6598_v44 = vld [vmem:[%s8769_s1 + $0x5f8] sm:$0xff] }
  0xd3   :  { %1885 = vmatmul.bf16.gmra.mxu2 %v1358_v60  ;;  %v6574_v53 = vld [vmem:[%s8769_s1 + $0x538] sm:$0xff] }
  0xd4   :  { %1913 = vmatmul.bf16.gmra.mxu3 %v1359_v61  ;;  %2064 = vmatpush.bf16.msra.mxu1 %v6517_v12  ;;  %v6582_v54 = vld [vmem:[%s8769_s1 + $0x578] sm:$0xff] }
  0xd5   :  { %v6524_v51 = vld [vmem:[%s8770_s0 + $0x1fc] sm:$0xf] }
  0xd6   :  { %v872_v4 = vpop.f32.mrf.mxu2  ;;  %v818_v8 = vpop.f32.mrf.mxu0  ;;  %2884 = vmatpush.bf16.msra.mxu2 %v6551_v13 }
  0xd7   :  { %v900_v6 = vpop.f32.mrf.mxu3  ;;  %v873_v7 = vadd.f32 %v872_v4, %v845_v62  ;;  %v846_v9 = vpop.f32.mrf.mxu1  ;;  %v4818_v62 = vor.u32 %v6436_v50, %v4815_v52  ;;  %v6560_v4 = vld [vmem:[%s8769_s1 + $0x4c8] sm:$0xff]  ;;  %v1325_v52 = vunpack.c.l.b16 %v4612_v49 }
  0xd8   :  { %2911 = vmatpush.bf16.msra.mxu3 %v6560_v4  ;;  %v7599_v50 = vld [vmem:[%s8770_s0 + $0x1ec] sm:$0xff] }
  0xd9   :  { %v7403_v10 = vadd.f32 %v900_v6, %v873_v7  ;;  %v1361_v3 = vpack.c.b16 %v1325_v52, %v1325_v52  ;;  %v5345_v52 = vld [vmem:[%s8770_s0 + $0x21c] sm:$0xf0] }
  0xdc   :  { %2912 = vmatpush.bf16.msra.mxu3 %v6559_v16  ;;  %v6588_v16 = vld [vmem:[%s8769_s1 + $0x5a8] sm:$0xff] }
  0xde   :  { %v874_v23 = vpop.f32.mrf.mxu2  ;;  %v7441_v27 = vpop.f32.mrf.mxu0 }
  0xdf   :  { %v902_v24 = vpop.f32.mrf.mxu3  ;;  %v7443_v28 = vpop.f32.mrf.mxu1 }
  0xe1   :  { %1926 = vmatmul.bf16.vlgmr.msrb.gmra.mxu0 %v4774_v25  ;;  %v4846_v25 = vor.u32 %v6444_v14, %v4843_v15  ;;  %v6573_v14 = vld [vmem:[%s8769_s1 + $0x530] sm:$0xff] }
  0xe2   :  { %1954 = vmatmul.bf16.vlgmr.msrb.gmra.mxu1 %v4778_v26  ;;  %v4850_v26 = vor.u32 %v6449_v18, %v4849_v17  ;;  %v6581_v15 = vld [vmem:[%s8769_s1 + $0x570] sm:$0xff]  ;;  %v6596_v17 = vld [vmem:[%s8769_s1 + $0x5e8] sm:$0xff]  ;;  %v914_v18 = vadd.f32 %v7441_v27, %v7259_v35  ;;  %v4787_v35 = vld [vmem:[%s8770_s0 + $0x138] sm:$0xf0] }
  0xe3   :  { %1982 = vmatmul.bf16.vlgmr.msrb.gmra.mxu2 %v4782_v29  ;;  %v6508_v29 = vld [vmem:[%s8769_s1 + $0x400] sm:$0xff]  ;;  %v4793_v27 = vld [vmem:[%s8770_s0 + $0x11c] sm:$0xf] }
  0xe4   :  { %2010 = vmatmul.bf16.vlgmr.msrb.gmra.mxu3 %v4786_v31  ;;  %v6516_v31 = vld [vmem:[%s8769_s1 + $0x440] sm:$0xff]  ;;  %2037 = vmatpush.bf16.msra.mxu0 %v6508_v29 }
  0xe5   :  { %2065 = vmatpush.bf16.msra.mxu1 %v6516_v31  ;;  %2989 = vmatpush.bf16.msrb.mxu2 %v6590_v41  ;;  %v6572_v31 = vld [vmem:[%s8769_s1 + $0x528] sm:$0xff]  ;;  %v6595_v41 = vld [vmem:[%s8769_s1 + $0x5e0] sm:$0xff] }
  0xe6   :  { %v7457_v37 = vpop.f32.mrf.mxu2  ;;  %v7461_v39 = vpop.f32.mrf.mxu0  ;;  %3017 = vmatpush.bf16.msrb.mxu3 %v6598_v44 }
  0xe7   :  { %v7459_v38 = vpop.f32.mrf.mxu3  ;;  %v7463_v40 = vpop.f32.mrf.mxu1  ;;  %v916_v44 = vadd.f32 %v7461_v39, %v7297_v58 }
  0xe8   :  { %2933 = vmatpush.bf16.msrb.mxu0 %v6574_v53 }
  0xe9   :  { %2961 = vmatpush.bf16.msrb.mxu1 %v6582_v54 }
  0xea   :  { %3018 = vmatpush.bf16.msrb.mxu3 %v6597_v42 }
  0xec   :  { %2934 = vmatpush.bf16.msrb.mxu0 %v6573_v14  ;;  %v6579_v14 = vld [vmem:[%s8769_s1 + $0x560] sm:$0xff] }
  0xed   :  { %2962 = vmatpush.bf16.msrb.mxu1 %v6581_v15 }
  0xee   :  { %v7501_v55 = vpop.f32.mrf.mxu2  ;;  %v7505_v60 = vpop.f32.mrf.mxu0  ;;  %3019 = vmatpush.bf16.msrb.mxu3 %v6596_v17 }
  0xef   :  { %v7503_v56 = vpop.f32.mrf.mxu3  ;;  %v7507_v61 = vpop.f32.mrf.mxu1  ;;  %v919_v15 = vadd.f32 %v7505_v60, %v7311_v5  ;;  %v6437_v5 = vld [vmem:[%s8770_s0 + $0x160] sm:$0xf]  ;;  %v4823_v60 = vld [vmem:[%s8770_s0 + $0x180] sm:$0xf0] }
  0xf0   :  { %2935 = vmatpush.bf16.msrb.mxu0 %v6572_v31  ;;  %v6578_v31 = vld [vmem:[%s8769_s1 + $0x558] sm:$0xff] }
  0xf1   :  { %1931 = vmatmul.bf16.gmra.mxu0 %v4810_v57  ;;  %v6589_v57 = vld [vmem:[%s8769_s1 + $0x5b0] sm:$0xff] }
  0xf2   :  { %1959 = vmatmul.bf16.gmra.mxu1 %v4814_v59  ;;  %v1326_v59 = vunpack.c.h.b16 %v4612_v49  ;;  %2990 = vmatpush.bf16.msrb.mxu2 %v6589_v57  ;;  %v6528_v49 = vld [vmem:[%s8770_s0 + $0x218] sm:$0xf0] }
  0xf3   :  { %1987 = vmatmul.bf16.gmra.mxu2 %v4818_v62  ;;  %v1327_v62 = vunpack.c.l.b16 %v7599_v50  ;;  %3020 = vmatpush.bf16.msrb.mxu3 %v6595_v41  ;;  %v6537_v41 = vld [vmem:[%s8770_s0 + $0x260] sm:$0xf0] }
  0xf4   :  { %2015 = vmatmul.bf16.gmra.mxu3 %v4822_v0  ;;  %v1362_v12 = vpack.c.b16 %v1326_v59, %v1326_v59 }
  0xf5   :  { %v1363_v13 = vpack.c.b16 %v1327_v62, %v1327_v62 }
  0xf6   :  { %v7521_v6 = vpop.f32.mrf.mxu2  ;;  %v7525_v8 = vpop.f32.mrf.mxu0  ;;  %2991 = vmatpush.bf16.msrb.mxu2 %v6588_v16 }
  0xf7   :  { %v7523_v7 = vpop.f32.mrf.mxu3  ;;  %v7527_v9 = vpop.f32.mrf.mxu1 }
  0xfe   :  { %v7565_v23 = vpop.f32.mrf.mxu2  ;;  %v7575_v32 = vpop.f32.mrf.mxu0 }
  0xff   :  { %v7567_v24 = vpop.f32.mrf.mxu3  ;;  %v7577_v33 = vpop.f32.mrf.mxu1 }
 0x101   :  { %1936 = vmatmul.bf16.gmra.mxu0 %v4846_v25  ;;  %v942_v25 = vadd.f32 %v7443_v28, %v914_v18  ;;  %v6580_v28 = vld [vmem:[%s8769_s1 + $0x568] sm:$0xff] }
 0x102   :  { %1964 = vmatmul.bf16.gmra.mxu1 %v4850_v26  ;;  %v6428_v26 = vld [vmem:[%s8770_s0 + $0x118] sm:$0xf] }
 0x103   :  { %1992 = vmatmul.bf16.gmra.mxu2 %v4854_v34  ;;  %v970_v29 = vadd.f32 %v7457_v37, %v942_v25  ;;  %v6587_v34 = vld [vmem:[%s8769_s1 + $0x5a0] sm:$0xff]  ;;  %v5343_v37 = vld [vmem:[%s8770_s0 + $0x1f8] sm:$0xf]  ;;  %2963 = vmatpush.bf16.msrb.mxu1 %v6580_v28  ;;  %v4790_v39 = vor.u32 %v6428_v26, %v4787_v35  ;;  %v947_v26 = vadd.f32 %v7507_v61, %v919_v15  ;;  %v6585_v28 = vld [vmem:[%s8769_s1 + $0x590] sm:$0xff] }
 0x104   :  { %2020 = vmatmul.bf16.gmra.mxu3 %v4858_v36  ;;  %v6433_v36 = vld [vmem:[%s8770_s0 + $0x13c] sm:$0xf0]  ;;  %2992 = vmatpush.bf16.msrb.mxu2 %v6587_v34  ;;  %v5344_v42 = vor.u32 %v6528_v49, %v5343_v37  ;;  %v6570_v61 = vld [vmem:[%s8769_s1 + $0x518] sm:$0xff]  ;;  %v921_v37 = vadd.f32 %v7525_v8, %v7355_v30  ;;  %v5381_v49 = vld [vmem:[%s8770_s0 + $0x264] sm:$0xf0]  ;;  %v4826_v8 = vor.u32 %v6437_v5, %v4823_v60 }
 0x105   :  { %v998_v53 = vadd.f32 %v7459_v38, %v970_v29  ;;  %v4794_v57 = vor.u32 %v6433_v36, %v4793_v27  ;;  %v6571_v38 = vld [vmem:[%s8769_s1 + $0x520] sm:$0xff]  ;;  %v975_v29 = vadd.f32 %v7521_v6, %v947_v26  ;;  %v6442_v6 = vld [vmem:[%s8770_s0 + $0x184] sm:$0xf0]  ;;  %v6593_v36 = vld [vmem:[%s8769_s1 + $0x5d0] sm:$0xff] }
 0x106   :  { %v7585_v45 = vpop.f32.mrf.mxu2  ;;  %v7589_v47 = vpop.f32.mrf.mxu0  ;;  %2936 = vmatpush.bf16.msrb.mxu0 %v6571_v38  ;;  %v5379_v34 = vld [vmem:[%s8770_s0 + $0x240] sm:$0xf]  ;;  %v5415_v5 = vld [vmem:[%s8770_s0 + $0x288] sm:$0xf] }
 0x107   :  { %v7587_v46 = vpop.f32.mrf.mxu3  ;;  %v7591_v48 = vpop.f32.mrf.mxu1  ;;  %2964 = vmatpush.bf16.msrb.mxu1 %v6579_v14  ;;  %v6591_v26 = vld [vmem:[%s8769_s1 + $0x5c0] sm:$0xff]  ;;  %v926_v60 = vadd.f32 %v7589_v47, %v7389_v63 }
 0x108   :  { %v6567_v47 = vld [vmem:[%s8769_s1 + $0x500] sm:$0xff] }
 0x10a   :  { %2937 = vmatpush.bf16.msrb.mxu0 %v6570_v61  ;;  %v5417_v61 = vld [vmem:[%s8770_s0 + $0x2ac] sm:$0xf0] }
 0x10b   :  { %2965 = vmatpush.bf16.msrb.mxu1 %v6578_v31 }
 0x10e   :  { %v7615_v0 = vpop.f32.mrf.mxu2  ;;  %v7619_v4 = vpop.f32.mrf.mxu0 }
 0x10f   :  { %v7617_v1 = vpop.f32.mrf.mxu3  ;;  %v7621_v11 = vpop.f32.mrf.mxu1 }
 0x111   :  { %1941 = vmatmul.bf16.gmra.mxu0 %v1360_v2  ;;  %v5348_v2 = vor.u32 %v6524_v51, %v5345_v52  ;;  %v1003_v51 = vadd.f32 %v7523_v7, %v975_v29  ;;  %v6569_v7 = vld [vmem:[%s8769_s1 + $0x510] sm:$0xff]  ;;  %v6542_v29 = vld [vmem:[%s8770_s0 + $0x28c] sm:$0xf] }
 0x112   :  { %1969 = vmatmul.bf16.gmra.mxu1 %v1361_v3  ;;  %v944_v3 = vadd.f32 %v7463_v40, %v916_v44  ;;  %v6586_v40 = vld [vmem:[%s8769_s1 + $0x598] sm:$0xff]  ;;  %v6533_v44 = vld [vmem:[%s8770_s0 + $0x244] sm:$0xf]  ;;  %2938 = vmatpush.bf16.msrb.mxu0 %v6569_v7 }
 0x113   :  { %1997 = vmatmul.bf16.gmra.mxu2 %v1362_v12 }
 0x114   :  { %2025 = vmatmul.bf16.gmra.mxu3 %v1363_v13  ;;  %v972_v13 = vadd.f32 %v7501_v55, %v944_v3  ;;  %v6594_v55 = vld [vmem:[%s8769_s1 + $0x5d8] sm:$0xff]  ;;  %2993 = vmatpush.bf16.msrb.mxu2 %v6586_v40 }
 0x115   :  { %3021 = vmatpush.bf16.msrb.mxu3 %v6594_v55 }
 0x116   :  { %v7637_v19 = vpop.f32.mrf.mxu2  ;;  %v930_v21 = vpop.f32.mrf.mxu0  ;;  %v1000_v16 = vadd.f32 %v7503_v56, %v972_v13  ;;  %v4829_v56 = vld [vmem:[%s8770_s0 + $0x164] sm:$0xf]  ;;  %v924_v13 = vadd.f32 %v7575_v32, %v7374_v43  ;;  %v6568_v43 = vld [vmem:[%s8769_s1 + $0x508] sm:$0xff] }
 0x117   :  { %v7639_v20 = vpop.f32.mrf.mxu3  ;;  %v958_v22 = vpop.f32.mrf.mxu1  ;;  %v6576_v32 = vld [vmem:[%s8769_s1 + $0x548] sm:$0xff]  ;;  %2939 = vmatpush.bf16.msrb.mxu0 %v6568_v43 }
 0x118   :  { %2994 = vmatpush.bf16.msrb.mxu2 %v6585_v28 }
 0x119   :  { %3022 = vmatpush.bf16.msrb.mxu3 %v6593_v36  ;;  %v6575_v36 = vld [vmem:[%s8769_s1 + $0x540] sm:$0xff] }
 0x11b   :  { %2940 = vmatpush.bf16.msrb.mxu0 %v6567_v47  ;;  %v6619_v47 = vld [vmem:[%s8769_s1 + $0x6a0] sm:$0xff] }
 0x11e   :  { %v986_v54 = vpop.f32.mrf.mxu2  ;;  %v1025_v59 = vpop.f32.mrf.mxu0 }
 0x11f   :  { %v1014_v58 = vpop.f32.mrf.mxu3  ;;  %v1843_v62 = vpop.f32.mrf.mxu1  ;;  %v1026_v12 = vadd.f32 %v1025_v59, %v998_v53  ;;  %v4830_v53 = vor.u32 %v6442_v6, %v4829_v56  ;;  %v5384_v59 = vor.u32 %v6533_v44, %v5381_v49  ;;  %v6546_v56 = vld [vmem:[%s8770_s0 + $0x2a8] sm:$0xf0] }
 0x120   :  { %v5416_v49 = vor.u32 %v6546_v56, %v5415_v5 }
 0x121   :  { %1044 = vst [vmem:[%s8771_s2] sm:$0xff] %v1026_v12  ;;  %2038 = vmatmul.bf16.vlgmr.msra.gmra.mxu0 %v4790_v39  ;;  %v6577_v12 = vld [vmem:[%s8769_s1 + $0x550] sm:$0xff] }
 0x122   :  { %2066 = vmatmul.bf16.vlgmr.msra.gmra.mxu1 %v4794_v57  ;;  %v5380_v57 = vor.u32 %v6537_v41, %v5379_v34 }
 0x123   :  { %2885 = vmatmul.bf16.vlgmr.msra.gmra.mxu2 %v5344_v42  ;;  %2966 = vmatpush.bf16.msrb.mxu1 %v6577_v12  ;;  %v1328_v12 = vunpack.c.h.b16 %v7599_v50 }
 0x124   :  { %2913 = vmatmul.bf16.vlgmr.msra.gmra.mxu3 %v5348_v2 }
 0x126   :  { %v1871_v17 = vpop.f32.mrf.mxu2  ;;  %v1027_v22 = vpop.f32.mrf.mxu0 }
 0x127   :  { %v1899_v18 = vpop.f32.mrf.mxu3  ;;  %v1872_v21 = vadd.f32 %v1871_v17, %v1843_v62  ;;  %v1845_v25 = vpop.f32.mrf.mxu1  ;;  %v1028_v35 = vadd.f32 %v1027_v22, %v1000_v16  ;;  %v949_v62 = vadd.f32 %v7527_v9, %v921_v37  ;;  %v6584_v9 = vld [vmem:[%s8769_s1 + $0x588] sm:$0xff]  ;;  %v952_v17 = vadd.f32 %v7577_v33, %v924_v13  ;;  %2967 = vmatpush.bf16.msrb.mxu1 %v6576_v32  ;;  %v6621_v13 = vld [vmem:[%s8769_s1 + $0x6b0] sm:$0xff] }
 0x128   :  { %2995 = vmatpush.bf16.msrb.mxu2 %v6584_v9  ;;  %v6446_v33 = vld [vmem:[%s8770_s0 + $0x1a8] sm:$0xf] }
 0x129   :  { %v7703_v27 = vadd.f32 %v1899_v18, %v1872_v21  ;;  %1045 = vst [vmem:[%s8771_s2 + $0x8] sm:$0xff] %v1028_v35  ;;  %v977_v3 = vadd.f32 %v7565_v23, %v949_v62  ;;  %v6592_v23 = vld [vmem:[%s8769_s1 + $0x5c8] sm:$0xff]  ;;  %v980_v22 = vadd.f32 %v7585_v45, %v952_v17  ;;  %v6451_v35 = vld [vmem:[%s8770_s0 + $0x1cc] sm:$0xf0] }
 0x12a   :  { %3023 = vmatpush.bf16.msrb.mxu3 %v6592_v23  ;;  %v4865_v45 = vld [vmem:[%s8770_s0 + $0x1ac] sm:$0xf]  ;;  %v6614_v23 = vld [vmem:[%s8769_s1 + $0x678] sm:$0xff] }
 0x12b   :  { %v1005_v38 = vadd.f32 %v7567_v24, %v977_v3  ;;  %v6583_v24 = vld [vmem:[%s8769_s1 + $0x580] sm:$0xff]  ;;  %v1008_v31 = vadd.f32 %v7587_v46, %v980_v22  ;;  %v4866_v63 = vor.u32 %v6451_v35, %v4865_v45  ;;  %2968 = vmatpush.bf16.msrb.mxu1 %v6575_v36  ;;  %v6655_v45 = vld [vmem:[%s8769_s1 + $0x6e8] sm:$0xff] }
 0x12c   :  { %2996 = vmatpush.bf16.msrb.mxu2 %v6583_v24  ;;  %v5353_v36 = vld [vmem:[%s8770_s0 + $0x224] sm:$0xf0] }
 0x12e   :  { %v1873_v52 = vpop.f32.mrf.mxu2  ;;  %v1030_v58 = vpop.f32.mrf.mxu0  ;;  %3024 = vmatpush.bf16.msrb.mxu3 %v6591_v26  ;;  %v6620_v26 = vld [vmem:[%s8769_s1 + $0x6a8] sm:$0xff] }
 0x12f   :  { %v1901_v30 = vpop.f32.mrf.mxu3  ;;  %v1874_v54 = vadd.f32 %v1873_v52, %v1845_v25  ;;  %v1848_v39 = vpop.f32.mrf.mxu1  ;;  %v1031_v42 = vadd.f32 %v1030_v58, %v1003_v51  ;;  %v4859_v25 = vld [vmem:[%s8770_s0 + $0x1c8] sm:$0xf0]  ;;  %v5420_v51 = vor.u32 %v6542_v29, %v5417_v61  ;;  %v954_v52 = vadd.f32 %v7591_v48, %v926_v60  ;;  %v6657_v48 = vld [vmem:[%s8769_s1 + $0x6f8] sm:$0xff]  ;;  %3073 = vmatpush.bf16.msra.mxu1 %v6614_v23 }
 0x130   :  { %v4862_v34 = vor.u32 %v6446_v33, %v4859_v25  ;;  %v6613_v25 = vld [vmem:[%s8769_s1 + $0x670] sm:$0xff]  ;;  %v6610_v23 = vld [vmem:[%s8769_s1 + $0x658] sm:$0xff] }
 0x131   :  { %v7749_v2 = vadd.f32 %v1901_v30, %v1874_v54  ;;  %1046 = vst [vmem:[%s8771_s2 + $0x10] sm:$0xff] %v1031_v42  ;;  %2043 = vmatmul.bf16.gmra.mxu0 %v4826_v8  ;;  %v982_v8 = vadd.f32 %v7615_v0, %v954_v52  ;;  %v929_v54 = vadd.f32 %v7619_v4, %v7403_v10  ;;  %v4614_v42 = vld [vmem:[%s8770_s0 + $0x1f4] sm:$0xf] }
 0x132   :  { %2071 = vmatmul.bf16.gmra.mxu1 %v4830_v53  ;;  %v6622_v53 = vld [vmem:[%s8769_s1 + $0x6b8] sm:$0xff]  ;;  %3920 = vmatpush.bf16.msra.mxu3 %v6657_v48  ;;  %v5192_v10 = vld [vmem:[%s8770_s0 + $0x2d0] sm:$0xff]  ;;  %v1329_v9 = vunpack.c.l.b16 %v4614_v42 }
 0x133   :  { %2890 = vmatmul.bf16.gmra.mxu2 %v5380_v57  ;;  %v1010_v0 = vadd.f32 %v7617_v1, %v982_v8  ;;  %v957_v3 = vadd.f32 %v7621_v11, %v929_v54  ;;  %v6606_v11 = vld [vmem:[%s8769_s1 + $0x638] sm:$0xff]  ;;  %3074 = vmatpush.bf16.msra.mxu1 %v6613_v25  ;;  %v6609_v25 = vld [vmem:[%s8769_s1 + $0x650] sm:$0xff] }
 0x134   :  { %2918 = vmatmul.bf16.gmra.mxu3 %v5384_v59  ;;  %3101 = vmatpush.bf16.msra.mxu2 %v6622_v53 }
 0x135   :  { %v985_v1 = vadd.f32 %v7637_v19, %v957_v3  ;;  %v2364_v19 = vunpack.c.l.b16 %v5192_v10  ;;  %3045 = vmatpush.bf16.msra.mxu0 %v6606_v11  ;;  %v6602_v11 = vld [vmem:[%s8769_s1 + $0x618] sm:$0xff] }
 0x136   :  { %v1876_v14 = vpop.f32.mrf.mxu2  ;;  %v1032_v15 = vpop.f32.mrf.mxu0 }
 0x137   :  { %v1904_v40 = vpop.f32.mrf.mxu3  ;;  %v1877_v55 = vadd.f32 %v1876_v14, %v1848_v39  ;;  %v1850_v16 = vpop.f32.mrf.mxu1  ;;  %v1033_v18 = vadd.f32 %v1032_v15, %v1005_v38  ;;  %v2365_v38 = vunpack.c.h.b16 %v5192_v10  ;;  %v6656_v14 = vld [vmem:[%s8769_s1 + $0x6f0] sm:$0xff]  ;;  %v1013_v50 = vadd.f32 %v7639_v20, %v985_v1  ;;  %v5387_v1 = vld [vmem:[%s8770_s0 + $0x248] sm:$0xf] }
 0x138   :  { %3102 = vmatpush.bf16.msra.mxu2 %v6621_v13  ;;  %3921 = vmatpush.bf16.msra.mxu3 %v6656_v14  ;;  %v1364_v15 = vpack.c.b16 %v1328_v12, %v1328_v12  ;;  %v2400_v32 = vpack.c.b16 %v2364_v19, %v2364_v19  ;;  %v6605_v20 = vld [vmem:[%s8769_s1 + $0x630] sm:$0xff]  ;;  %v6538_v12 = vld [vmem:[%s8770_s0 + $0x268] sm:$0xf0] }
 0x139   :  { %v7771_v21 = vadd.f32 %v1904_v40, %v1877_v55  ;;  %1047 = vst [vmem:[%s8771_s2 + $0x18] sm:$0xff] %v1033_v18  ;;  %v2401_v24 = vpack.c.b16 %v2365_v38, %v2365_v38  ;;  %3046 = vmatpush.bf16.msra.mxu0 %v6605_v20  ;;  %v6617_v13 = vld [vmem:[%s8769_s1 + $0x690] sm:$0xff] }
 0x13a   :  { %v5389_v19 = vld [vmem:[%s8770_s0 + $0x26c] sm:$0xf0] }
 0x13b   :  { %v5395_v38 = vld [vmem:[%s8770_s0 + $0x250] sm:$0xf] }
 0x13c   :  { %3103 = vmatpush.bf16.msra.mxu2 %v6620_v26  ;;  %3922 = vmatpush.bf16.msra.mxu3 %v6655_v45  ;;  %v6652_v14 = vld [vmem:[%s8769_s1 + $0x6d0] sm:$0xff]  ;;  %v6616_v26 = vld [vmem:[%s8769_s1 + $0x688] sm:$0xff] }
 0x13d   :  { %v6601_v20 = vld [vmem:[%s8769_s1 + $0x610] sm:$0xff]  ;;  %v6651_v45 = vld [vmem:[%s8769_s1 + $0x6c8] sm:$0xff] }
 0x13e   :  { %v1878_v28 = vpop.f32.mrf.mxu2  ;;  %v1035_v41 = vpop.f32.mrf.mxu0 }
 0x13f   :  { %v1906_v6 = vpop.f32.mrf.mxu3  ;;  %v1879_v37 = vadd.f32 %v1878_v28, %v1850_v16  ;;  %v1853_v44 = vpop.f32.mrf.mxu1  ;;  %v1036_v46 = vadd.f32 %v1035_v41, %v1008_v31  ;;  %v1365_v16 = vpack.c.b16 %v1329_v9, %v1329_v9  ;;  %v5351_v31 = vld [vmem:[%s8770_s0 + $0x200] sm:$0xf]  ;;  %v6529_v28 = vld [vmem:[%s8770_s0 + $0x220] sm:$0xf0]  ;;  %v6534_v9 = vld [vmem:[%s8770_s0 + $0x24c] sm:$0xf] }
 0x140   :  { %v6654_v41 = vld [vmem:[%s8769_s1 + $0x6e0] sm:$0xff]  ;;  %3104 = vmatpush.bf16.msra.mxu2 %v6619_v47  ;;  %v5352_v8 = vor.u32 %v6529_v28, %v5351_v31  ;;  %v6608_v31 = vld [vmem:[%s8769_s1 + $0x648] sm:$0xff]  ;;  %v6543_v47 = vld [vmem:[%s8770_s0 + $0x294] sm:$0xf] }
 0x141   :  { %v7823_v30 = vadd.f32 %v1906_v6, %v1879_v37  ;;  %1048 = vst [vmem:[%s8771_s2 + $0x20] sm:$0xff] %v1036_v46  ;;  %2048 = vmatmul.bf16.gmra.mxu0 %v4862_v34  ;;  %v6525_v6 = vld [vmem:[%s8770_s0 + $0x204] sm:$0xf]  ;;  %v6604_v34 = vld [vmem:[%s8769_s1 + $0x628] sm:$0xff]  ;;  %3923 = vmatpush.bf16.msra.mxu3 %v6654_v41  ;;  %v6548_v41 = vld [vmem:[%s8770_s0 + $0x2b8] sm:$0xf0] }
 0x142   :  { %2076 = vmatmul.bf16.gmra.mxu1 %v4866_v63  ;;  %v6612_v63 = vld [vmem:[%s8769_s1 + $0x668] sm:$0xff]  ;;  %3047 = vmatpush.bf16.msra.mxu0 %v6604_v34  ;;  %v5356_v53 = vor.u32 %v6525_v6, %v5353_v36  ;;  %v6615_v28 = vld [vmem:[%s8769_s1 + $0x680] sm:$0xff]  ;;  %v5423_v6 = vld [vmem:[%s8770_s0 + $0x290] sm:$0xf] }
 0x143   :  { %2895 = vmatmul.bf16.gmra.mxu2 %v5416_v49  ;;  %v5359_v37 = vld [vmem:[%s8770_s0 + $0x208] sm:$0xf]  ;;  %v6526_v49 = vld [vmem:[%s8770_s0 + $0x20c] sm:$0xf]  ;;  %3075 = vmatpush.bf16.msra.mxu1 %v6612_v63  ;;  %v6547_v34 = vld [vmem:[%s8770_s0 + $0x2b0] sm:$0xf0] }
 0x144   :  { %2923 = vmatmul.bf16.gmra.mxu3 %v5420_v51  ;;  %v5361_v51 = vld [vmem:[%s8770_s0 + $0x22c] sm:$0xf0]  ;;  %v6650_v63 = vld [vmem:[%s8769_s1 + $0x6c0] sm:$0xff]  ;;  %v5425_v36 = vld [vmem:[%s8770_s0 + $0x2b4] sm:$0xf0] }
 0x146   :  { %v1881_v58 = vpop.f32.mrf.mxu2  ;;  %v1037_v59 = vpop.f32.mrf.mxu0 }
 0x147   :  { %v1909_v39 = vpop.f32.mrf.mxu3  ;;  %v1882_v57 = vadd.f32 %v1881_v58, %v1853_v44  ;;  %v1855_v62 = vpop.f32.mrf.mxu1  ;;  %v1038_v7 = vadd.f32 %v1037_v59, %v1010_v0  ;;  %v6530_v44 = vld [vmem:[%s8770_s0 + $0x228] sm:$0xf0]  ;;  %v5364_v58 = vor.u32 %v6526_v49, %v5361_v51  ;;  %v6618_v59 = vld [vmem:[%s8769_s1 + $0x698] sm:$0xff]  ;;  %v5433_v49 = vld [vmem:[%s8770_s0 + $0x2bc] sm:$0xf0] }
 0x148   :  { %v5360_v0 = vor.u32 %v6530_v44, %v5359_v37  ;;  %3105 = vmatpush.bf16.msra.mxu2 %v6618_v59  ;;  %v5431_v37 = vld [vmem:[%s8770_s0 + $0x298] sm:$0xf]  ;;  %v6544_v44 = vld [vmem:[%s8770_s0 + $0x29c] sm:$0xf] }
 0x149   :  { %v7845_v4 = vadd.f32 %v1909_v39, %v1882_v57  ;;  %1049 = vst [vmem:[%s8771_s2 + $0x28] sm:$0xff] %v1038_v7  ;;  %v6603_v39 = vld [vmem:[%s8769_s1 + $0x620] sm:$0xff]  ;;  %v5436_v59 = vor.u32 %v6544_v44, %v5433_v49  ;;  %v5367_v49 = vld [vmem:[%s8770_s0 + $0x210] sm:$0xf] }
 0x14a   :  { %v6611_v57 = vld [vmem:[%s8769_s1 + $0x660] sm:$0xff]  ;;  %3048 = vmatpush.bf16.msra.mxu0 %v6603_v39 }
 0x14b   :  { %3076 = vmatpush.bf16.msra.mxu1 %v6611_v57  ;;  %v5432_v57 = vor.u32 %v6548_v41, %v5431_v37 }
 0x14c   :  { %3106 = vmatpush.bf16.msra.mxu2 %v6617_v13  ;;  %v5193_v13 = vld [vmem:[%s8770_s0 + $0x2d8] sm:$0xff] }
 0x14e   :  { %v1883_v40 = vpop.f32.mrf.mxu2  ;;  %v1040_v18 = vpop.f32.mrf.mxu0  ;;  %3049 = vmatpush.bf16.msra.mxu0 %v6602_v11 }
 0x14f   :  { %v1911_v55 = vpop.f32.mrf.mxu3  ;;  %v1884_v17 = vadd.f32 %v1883_v40, %v1855_v62  ;;  %v1858_v43 = vpop.f32.mrf.mxu1  ;;  %v1041_v22 = vadd.f32 %v1040_v18, %v1013_v50  ;;  %v6653_v62 = vld [vmem:[%s8769_s1 + $0x6d8] sm:$0xff]  ;;  %v6539_v50 = vld [vmem:[%s8770_s0 + $0x270] sm:$0xf0]  ;;  %3077 = vmatpush.bf16.msra.mxu1 %v6610_v23  ;;  %v5392_v18 = vor.u32 %v6534_v9, %v5389_v19  ;;  %v5194_v19 = vld [vmem:[%s8770_s0 + $0x2e0] sm:$0xff] }
 0x150   :  { %3924 = vmatpush.bf16.msra.mxu3 %v6653_v62  ;;  %v6535_v40 = vld [vmem:[%s8770_s0 + $0x254] sm:$0xf]  ;;  %3107 = vmatpush.bf16.msra.mxu2 %v6616_v26  ;;  %v6681_v62 = vld [vmem:[%s8769_s1 + $0x7b8] sm:$0xff] }
 0x151   :  { %v7865_v33 = vadd.f32 %v1911_v55, %v1884_v17  ;;  %1050 = vst [vmem:[%s8771_s2 + $0x30] sm:$0xff] %v1041_v22  ;;  %2053 = vmatmul.bf16.gmra.mxu0 %v1364_v15  ;;  %v5397_v55 = vld [vmem:[%s8770_s0 + $0x274] sm:$0xf0]  ;;  %v5388_v17 = vor.u32 %v6538_v12, %v5387_v1 }
 0x152   :  { %2081 = vmatmul.bf16.gmra.mxu1 %v1365_v16  ;;  %v5400_v22 = vor.u32 %v6535_v40, %v5397_v55  ;;  %3050 = vmatpush.bf16.msra.mxu0 %v6601_v20  ;;  %v6689_v1 = vld [vmem:[%s8769_s1 + $0x7f8] sm:$0xff]  ;;  %v2369_v40 = vunpack.c.h.b16 %v5194_v19 }
 0x153   :  { %2900 = vmatmul.bf16.gmra.mxu2 %v2400_v32  ;;  %3078 = vmatpush.bf16.msra.mxu1 %v6609_v25  ;;  %v6665_v55 = vld [vmem:[%s8769_s1 + $0x738] sm:$0xff] }
 0x154   :  { %2928 = vmatmul.bf16.gmra.mxu3 %v2401_v24  ;;  %v5396_v24 = vor.u32 %v6539_v50, %v5395_v38  ;;  %3108 = vmatpush.bf16.msra.mxu2 %v6615_v28  ;;  %v2366_v38 = vunpack.c.l.b16 %v5193_v13  ;;  %v2368_v50 = vunpack.c.l.b16 %v5194_v19  ;;  %v2405_v28 = vpack.c.b16 %v2369_v40, %v2369_v40  ;;  %v6678_v19 = vld [vmem:[%s8769_s1 + $0x7a0] sm:$0xff] }
 0x155   :  { %3925 = vmatpush.bf16.msra.mxu3 %v6652_v14  ;;  %v2367_v14 = vunpack.c.h.b16 %v5193_v13  ;;  %v6671_v13 = vld [vmem:[%s8769_s1 + $0x768] sm:$0xff] }
 0x156   :  { %v1886_v35 = vpop.f32.mrf.mxu2  ;;  %v1042_v56 = vpop.f32.mrf.mxu0  ;;  %v2402_v25 = vpack.c.b16 %v2366_v38, %v2366_v38  ;;  %v6686_v38 = vld [vmem:[%s8769_s1 + $0x7e0] sm:$0xff] }
 0x157   :  { %v1914_v5 = vpop.f32.mrf.mxu3  ;;  %v1887_v60 = vadd.f32 %v1886_v35, %v1858_v43  ;;  %v1860_v29 = vpop.f32.mrf.mxu1  ;;  %3079 = vmatpush.bf16.msra.mxu1 %v6608_v31  ;;  %v2403_v26 = vpack.c.b16 %v2367_v14, %v2367_v14  ;;  %v2404_v31 = vpack.c.b16 %v2368_v50, %v2368_v50 }
 0x158   :  { %v6600_v29 = vld [vmem:[%s8769_s1 + $0x608] sm:$0xff] }
 0x159   :  { %v7882_v61 = vadd.f32 %v1914_v5, %v1887_v60  ;;  %3926 = vmatpush.bf16.msra.mxu3 %v6651_v45  ;;  %3051 = vmatpush.bf16.msra.mxu0 %v6600_v29 }
 0x15d   :  { %3927 = vmatpush.bf16.msra.mxu3 %v6650_v63  ;;  %v6672_v63 = vld [vmem:[%s8769_s1 + $0x770] sm:$0xff] }
 0x15e   :  { %v1888_v52 = vpop.f32.mrf.mxu2  ;;  %v7920_v48 = vpop.f32.mrf.mxu0 }
 0x15f   :  { %v1916_v46 = vpop.f32.mrf.mxu3  ;;  %v7922_v54 = vpop.f32.mrf.mxu1 }
 0x160   :  { %v5424_v46 = vor.u32 %v6547_v34, %v5423_v6  ;;  %v1928_v6 = vadd.f32 %v7920_v48, %v7703_v27  ;;  %v6664_v34 = vld [vmem:[%s8769_s1 + $0x730] sm:$0xff] }
 0x161   :  { %2941 = vmatmul.bf16.vlgmr.msrb.gmra.mxu0 %v5352_v8  ;;  %v5428_v8 = vor.u32 %v6543_v47, %v5425_v36  ;;  %v6679_v47 = vld [vmem:[%s8769_s1 + $0x7a8] sm:$0xff] }
 0x162   :  { %2969 = vmatmul.bf16.vlgmr.msrb.gmra.mxu1 %v5356_v53  ;;  %v6599_v53 = vld [vmem:[%s8769_s1 + $0x600] sm:$0xff]  ;;  %v6687_v36 = vld [vmem:[%s8769_s1 + $0x7e8] sm:$0xff]  ;;  %v1956_v44 = vadd.f32 %v7922_v54, %v1928_v6  ;;  %v5375_v54 = vld [vmem:[%s8770_s0 + $0x218] sm:$0xf] }
 0x163   :  { %2997 = vmatmul.bf16.vlgmr.msrb.gmra.mxu2 %v5360_v0  ;;  %v6607_v0 = vld [vmem:[%s8769_s1 + $0x640] sm:$0xff]  ;;  %3052 = vmatpush.bf16.msra.mxu0 %v6599_v53  ;;  %v6527_v53 = vld [vmem:[%s8770_s0 + $0x214] sm:$0xf] }
 0x164   :  { %3025 = vmatmul.bf16.vlgmr.msrb.gmra.mxu3 %v5364_v58  ;;  %3080 = vmatpush.bf16.msra.mxu1 %v6607_v0  ;;  %v5369_v0 = vld [vmem:[%s8770_s0 + $0x234] sm:$0xf0]  ;;  %v6662_v6 = vld [vmem:[%s8769_s1 + $0x720] sm:$0xff] }
 0x165   :  { %4004 = vmatpush.bf16.msrb.mxu2 %v6681_v62  ;;  %4032 = vmatpush.bf16.msrb.mxu3 %v6689_v1  ;;  %v6663_v1 = vld [vmem:[%s8769_s1 + $0x728] sm:$0xff]  ;;  %v5372_v40 = vor.u32 %v6527_v53, %v5369_v0  ;;  %v6536_v53 = vld [vmem:[%s8770_s0 + $0x25c] sm:$0xf]  ;;  %v5411_v0 = vld [vmem:[%s8770_s0 + $0x260] sm:$0xf] }
 0x166   :  { %v7936_v42 = vpop.f32.mrf.mxu2  ;;  %v7940_v7 = vpop.f32.mrf.mxu0 }
 0x167   :  { %v7938_v3 = vpop.f32.mrf.mxu3  ;;  %v7942_v10 = vpop.f32.mrf.mxu1  ;;  %3948 = vmatpush.bf16.msrb.mxu0 %v6665_v55  ;;  %v1930_v62 = vadd.f32 %v7940_v7, %v7749_v2 }
 0x16b   :  { %3949 = vmatpush.bf16.msrb.mxu0 %v6664_v34 }
 0x16e   :  { %v7980_v15 = vpop.f32.mrf.mxu2  ;;  %v7984_v43 = vpop.f32.mrf.mxu0 }
 0x16f   :  { %v7982_v16 = vpop.f32.mrf.mxu3  ;;  %v7986_v32 = vpop.f32.mrf.mxu1  ;;  %3950 = vmatpush.bf16.msrb.mxu0 %v6663_v1  ;;  %v6676_v1 = vld [vmem:[%s8769_s1 + $0x790] sm:$0xff] }
 0x171   :  { %2946 = vmatmul.bf16.gmra.mxu0 %v5388_v17  ;;  %v6673_v17 = vld [vmem:[%s8769_s1 + $0x778] sm:$0xff] }
 0x172   :  { %2974 = vmatmul.bf16.gmra.mxu1 %v5392_v18  ;;  %v6680_v18 = vld [vmem:[%s8769_s1 + $0x7b0] sm:$0xff] }
 0x173   :  { %3002 = vmatmul.bf16.gmra.mxu2 %v5396_v24  ;;  %v6688_v24 = vld [vmem:[%s8769_s1 + $0x7f0] sm:$0xff]  ;;  %3976 = vmatpush.bf16.msrb.mxu1 %v6673_v17 }
 0x174   :  { %3030 = vmatmul.bf16.gmra.mxu3 %v5400_v22  ;;  %4005 = vmatpush.bf16.msrb.mxu2 %v6680_v18 }
 0x175   :  { %4033 = vmatpush.bf16.msrb.mxu3 %v6688_v24  ;;  %3951 = vmatpush.bf16.msrb.mxu0 %v6662_v6 }
 0x176   :  { %v8000_v35 = vpop.f32.mrf.mxu2  ;;  %v8004_v60 = vpop.f32.mrf.mxu0 }
 0x177   :  { %v8002_v5 = vpop.f32.mrf.mxu3  ;;  %v8006_v56 = vpop.f32.mrf.mxu1  ;;  %3977 = vmatpush.bf16.msrb.mxu1 %v6672_v63 }
 0x178   :  { %4006 = vmatpush.bf16.msrb.mxu2 %v6679_v47 }
 0x179   :  { %4034 = vmatpush.bf16.msrb.mxu3 %v6687_v36 }
 0x17b   :  { %3978 = vmatpush.bf16.msrb.mxu1 %v6671_v13 }
 0x17c   :  { %4007 = vmatpush.bf16.msrb.mxu2 %v6678_v19 }
 0x17d   :  { %4035 = vmatpush.bf16.msrb.mxu3 %v6686_v38 }
 0x17e   :  { %v8044_v51 = vpop.f32.mrf.mxu2  ;;  %v8054_v58 = vpop.f32.mrf.mxu0 }
 0x17f   :  { %v8046_v52 = vpop.f32.mrf.mxu3  ;;  %v8056_v39 = vpop.f32.mrf.mxu1 }
 0x181   :  { %2951 = vmatmul.bf16.gmra.mxu0 %v5424_v46  ;;  %v6531_v46 = vld [vmem:[%s8770_s0 + $0x230] sm:$0xf0] }
 0x182   :  { %2979 = vmatmul.bf16.gmra.mxu1 %v5428_v8  ;;  %v1984_v8 = vadd.f32 %v7936_v42, %v1956_v44  ;;  %v5925_v42 = vld [vmem:[%s8770_s0 + $0x2f4] sm:$0xf]  ;;  %v5368_v7 = vor.u32 %v6531_v46, %v5367_v49  ;;  %v5403_v49 = vld [vmem:[%s8770_s0 + $0x258] sm:$0xf] }
 0x183   :  { %3007 = vmatmul.bf16.gmra.mxu2 %v5432_v57  ;;  %v6532_v57 = vld [vmem:[%s8770_s0 + $0x238] sm:$0xf0] }
 0x184   :  { %3035 = vmatmul.bf16.gmra.mxu3 %v5436_v59  ;;  %v6627_v59 = vld [vmem:[%s8770_s0 + $0x314] sm:$0xf0]  ;;  %v2012_v14 = vadd.f32 %v7938_v3, %v1984_v8  ;;  %v5376_v18 = vor.u32 %v6532_v57, %v5375_v54  ;;  %v1933_v3 = vadd.f32 %v7984_v43, %v7771_v21  ;;  %v6541_v54 = vld [vmem:[%s8770_s0 + $0x280] sm:$0xf0]  ;;  %v6636_v57 = vld [vmem:[%s8770_s0 + $0x35c] sm:$0xf0] }
 0x185   :  { %v5926_v24 = vor.u32 %v6627_v59, %v5925_v42  ;;  %v6685_v21 = vld [vmem:[%s8769_s1 + $0x7d8] sm:$0xff]  ;;  %v1935_v42 = vadd.f32 %v8004_v60, %v7823_v30  ;;  %v6684_v30 = vld [vmem:[%s8769_s1 + $0x7d0] sm:$0xff] }
 0x186   :  { %v8064_v12 = vpop.f32.mrf.mxu2  ;;  %v8068_v11 = vpop.f32.mrf.mxu0  ;;  %4036 = vmatpush.bf16.msrb.mxu3 %v6685_v21  ;;  %v6661_v59 = vld [vmem:[%s8769_s1 + $0x718] sm:$0xff]  ;;  %v6667_v21 = vld [vmem:[%s8769_s1 + $0x748] sm:$0xff] }
 0x187   :  { %v8066_v9 = vpop.f32.mrf.mxu3  ;;  %v8070_v23 = vpop.f32.mrf.mxu1  ;;  %3952 = vmatpush.bf16.msrb.mxu0 %v6661_v59 }
 0x18a   :  { %4037 = vmatpush.bf16.msrb.mxu3 %v6684_v30 }
 0x18e   :  { %v8090_v22 = vpop.f32.mrf.mxu2  ;;  %v8094_v45 = vpop.f32.mrf.mxu0 }
 0x18f   :  { %v8092_v20 = vpop.f32.mrf.mxu3  ;;  %v8096_v29 = vpop.f32.mrf.mxu1 }
 0x191   :  { %2956 = vmatmul.bf16.gmra.mxu0 %v2402_v25  ;;  %v1958_v25 = vadd.f32 %v7942_v10, %v1930_v62  ;;  %v6670_v10 = vld [vmem:[%s8769_s1 + $0x760] sm:$0xff]  ;;  %v6669_v62 = vld [vmem:[%s8769_s1 + $0x758] sm:$0xff] }
 0x192   :  { %2984 = vmatmul.bf16.gmra.mxu1 %v2403_v26 }
 0x193   :  { %3012 = vmatmul.bf16.gmra.mxu2 %v2404_v31  ;;  %v1986_v31 = vadd.f32 %v7980_v15, %v1958_v25  ;;  %v6677_v15 = vld [vmem:[%s8769_s1 + $0x798] sm:$0xff]  ;;  %3979 = vmatpush.bf16.msrb.mxu1 %v6670_v10  ;;  %v1938_v25 = vadd.f32 %v8054_v58, %v7845_v4  ;;  %v6683_v4 = vld [vmem:[%s8769_s1 + $0x7c8] sm:$0xff] }
 0x194   :  { %3040 = vmatmul.bf16.gmra.mxu3 %v2405_v28  ;;  %4008 = vmatpush.bf16.msrb.mxu2 %v6677_v15  ;;  %v6659_v15 = vld [vmem:[%s8769_s1 + $0x708] sm:$0xff] }
 0x195   :  { %v2014_v43 = vadd.f32 %v7982_v16, %v1986_v31  ;;  %v6540_v16 = vld [vmem:[%s8770_s0 + $0x278] sm:$0xf0]  ;;  %4038 = vmatpush.bf16.msrb.mxu3 %v6683_v4  ;;  %v6712_v4 = vld [vmem:[%s8769_s1 + $0x8b0] sm:$0xff] }
 0x196   :  { %v8112_v37 = vpop.f32.mrf.mxu2  ;;  %v1944_v27 = vpop.f32.mrf.mxu0  ;;  %v5404_v38 = vor.u32 %v6540_v16, %v5403_v49  ;;  %v5441_v49 = vld [vmem:[%s8770_s0 + $0x2c4] sm:$0xf0]  ;;  %v6550_v16 = vld [vmem:[%s8770_s0 + $0x2c8] sm:$0xf0] }
 0x197   :  { %v8114_v41 = vpop.f32.mrf.mxu3  ;;  %v1972_v48 = vpop.f32.mrf.mxu1  ;;  %3980 = vmatpush.bf16.msrb.mxu1 %v6669_v62 }
 0x198   :  { %v1961_v48 = vadd.f32 %v7986_v32, %v1933_v3  ;;  %v5405_v32 = vld [vmem:[%s8770_s0 + $0x27c] sm:$0xf0]  ;;  %4009 = vmatpush.bf16.msrb.mxu2 %v6676_v1 }
 0x19a   :  { %v1989_v46 = vadd.f32 %v8000_v35, %v1961_v48  ;;  %v5961_v35 = vld [vmem:[%s8770_s0 + $0x33c] sm:$0xf]  ;;  %v5439_v48 = vld [vmem:[%s8770_s0 + $0x2a0] sm:$0xf] }
 0x19c   :  { %v2017_v60 = vadd.f32 %v8002_v5, %v1989_v46  ;;  %v1940_v46 = vadd.f32 %v8068_v11, %v7865_v33  ;;  %v6658_v33 = vld [vmem:[%s8769_s1 + $0x700] sm:$0xff] }
 0x19d   :  { %v6666_v11 = vld [vmem:[%s8769_s1 + $0x740] sm:$0xff] }
 0x19e   :  { %v2000_v50 = vpop.f32.mrf.mxu2  ;;  %v2039_v55 = vpop.f32.mrf.mxu0 }
 0x19f   :  { %v2028_v2 = vpop.f32.mrf.mxu3  ;;  %v2067_v17 = vpop.f32.mrf.mxu1  ;;  %v2040_v26 = vadd.f32 %v2039_v55, %v2012_v14  ;;  %v5408_v14 = vor.u32 %v6536_v53, %v5405_v32  ;;  %v5962_v55 = vor.u32 %v6636_v57, %v5961_v35  ;;  %v6645_v53 = vld [vmem:[%s8770_s0 + $0x3a4] sm:$0xf0] }
 0x1a1   :  { %v2068_v28 = vadd.f32 %v2067_v17, %v2040_v26  ;;  %3053 = vmatmul.bf16.vlgmr.msra.gmra.mxu0 %v5368_v7  ;;  %v1963_v17 = vadd.f32 %v8006_v56, %v1935_v42  ;;  %v6660_v26 = vld [vmem:[%s8769_s1 + $0x710] sm:$0xff] }
 0x1a2   :  { %3081 = vmatmul.bf16.vlgmr.msra.gmra.mxu1 %v5372_v40  ;;  %v5412_v40 = vor.u32 %v6541_v54, %v5411_v0  ;;  %v6668_v56 = vld [vmem:[%s8769_s1 + $0x750] sm:$0xff]  ;;  %3953 = vmatpush.bf16.msrb.mxu0 %v6660_v26 }
 0x1a3   :  { %3109 = vmatmul.bf16.vlgmr.msra.gmra.mxu2 %v5376_v18  ;;  %5155 = vst [vmem:[%s8771_s2 + $0x38] sm:$0xff] %v2068_v28  ;;  %3981 = vmatpush.bf16.msrb.mxu1 %v6668_v56 }
 0x1a4   :  { %3928 = vmatmul.bf16.vlgmr.msra.gmra.mxu3 %v5926_v24  ;;  %v1991_v24 = vadd.f32 %v8044_v51, %v1963_v17  ;;  %v6675_v51 = vld [vmem:[%s8769_s1 + $0x788] sm:$0xff] }
 0x1a5   :  { %4010 = vmatpush.bf16.msrb.mxu2 %v6675_v51  ;;  %v6697_v51 = vld [vmem:[%s8769_s1 + $0x838] sm:$0xff] }
 0x1a6   :  { %v2886_v34 = vpop.f32.mrf.mxu2  ;;  %v2041_v36 = vpop.f32.mrf.mxu0  ;;  %v2019_v58 = vadd.f32 %v8046_v52, %v1991_v24  ;;  %v6674_v52 = vld [vmem:[%s8769_s1 + $0x780] sm:$0xff]  ;;  %3954 = vmatpush.bf16.msrb.mxu0 %v6659_v15  ;;  %v5196_v24 = vld [vmem:[%s8770_s0 + $0x2f0] sm:$0xf] }
 0x1a7   :  { %v2914_v63 = vpop.f32.mrf.mxu3  ;;  %v2069_v27 = vpop.f32.mrf.mxu1  ;;  %v2042_v44 = vadd.f32 %v2041_v36, %v2014_v43  ;;  %v1966_v43 = vadd.f32 %v8056_v39, %v1938_v25  ;;  %v6545_v39 = vld [vmem:[%s8770_s0 + $0x2a4] sm:$0xf]  ;;  %3982 = vmatpush.bf16.msrb.mxu1 %v6667_v21 }
 0x1a8   :  { %v8177_v47 = vadd.f32 %v2914_v63, %v2886_v34  ;;  %v6682_v63 = vld [vmem:[%s8769_s1 + $0x7c0] sm:$0xff]  ;;  %v5444_v57 = vor.u32 %v6545_v39, %v5441_v49  ;;  %v6711_v39 = vld [vmem:[%s8769_s1 + $0x8a8] sm:$0xff] }
 0x1a9   :  { %v2070_v8 = vadd.f32 %v2069_v27, %v2042_v44  ;;  %v1994_v36 = vadd.f32 %v8064_v12, %v1966_v43  ;;  %v6549_v44 = vld [vmem:[%s8770_s0 + $0x2c0] sm:$0xf0]  ;;  %v5447_v12 = vld [vmem:[%s8770_s0 + $0x2a8] sm:$0xf]  ;;  %4011 = vmatpush.bf16.msrb.mxu2 %v6674_v52  ;;  %4039 = vmatpush.bf16.msrb.mxu3 %v6682_v63 }
 0x1aa   :  { %v5440_v35 = vor.u32 %v6549_v44, %v5439_v48  ;;  %v5448_v1 = vor.u32 %v6550_v16, %v5447_v12  ;;  %3955 = vmatpush.bf16.msrb.mxu0 %v6658_v33  ;;  %v6696_v44 = vld [vmem:[%s8769_s1 + $0x830] sm:$0xff]  ;;  %v6719_v49 = vld [vmem:[%s8769_s1 + $0x8e8] sm:$0xff]  ;;  %v6710_v33 = vld [vmem:[%s8769_s1 + $0x8a0] sm:$0xff] }
 0x1ab   :  { %5156 = vst [vmem:[%s8771_s2 + $0x40] sm:$0xff] %v2070_v8  ;;  %v5997_v8 = vld [vmem:[%s8770_s0 + $0x384] sm:$0xf]  ;;  %v2022_v32 = vadd.f32 %v8066_v9, %v1994_v36  ;;  %v1968_v9 = vadd.f32 %v8070_v23, %v1940_v46  ;;  %3983 = vmatpush.bf16.msrb.mxu1 %v6666_v11  ;;  %v1943_v23 = vadd.f32 %v8094_v45, %v7882_v61  ;;  %v6628_v11 = vld [vmem:[%s8770_s0 + $0x31c] sm:$0xf0] }
 0x1ac   :  { %v5998_v30 = vor.u32 %v6645_v53, %v5997_v8 }
 0x1ad   :  { %v1971_v61 = vadd.f32 %v8096_v29, %v1943_v23  ;;  %v6705_v29 = vld [vmem:[%s8769_s1 + $0x878] sm:$0xff] }
 0x1ae   :  { %v2888_v13 = vpop.f32.mrf.mxu2  ;;  %v2044_v2 = vpop.f32.mrf.mxu0  ;;  %4060 = vmatpush.bf16.msra.mxu0 %v6697_v51  ;;  %v6693_v51 = vld [vmem:[%s8769_s1 + $0x818] sm:$0xff] }
 0x1af   :  { %v2916_v19 = vpop.f32.mrf.mxu3  ;;  %v2072_v7 = vpop.f32.mrf.mxu1  ;;  %v2045_v18 = vadd.f32 %v2044_v2, %v2017_v60  ;;  %4088 = vmatpush.bf16.msra.mxu1 %v6705_v29  ;;  %v6701_v29 = vld [vmem:[%s8769_s1 + $0x858] sm:$0xff] }
 0x1b0   :  { %v8223_v50 = vadd.f32 %v2916_v19, %v2888_v13  ;;  %v1996_v13 = vadd.f32 %v8090_v22, %v1968_v9  ;;  %v6629_v9 = vld [vmem:[%s8770_s0 + $0x324] sm:$0xf0] }
 0x1b1   :  { %v2073_v5 = vadd.f32 %v2072_v7, %v2045_v18  ;;  %3058 = vmatmul.bf16.gmra.mxu0 %v5404_v38  ;;  %v6713_v38 = vld [vmem:[%s8769_s1 + $0x8b8] sm:$0xff]  ;;  %v5195_v18 = vld [vmem:[%s8770_s0 + $0x2e8] sm:$0xff] }
 0x1b2   :  { %3086 = vmatmul.bf16.gmra.mxu1 %v5408_v14  ;;  %v6721_v14 = vld [vmem:[%s8769_s1 + $0x8f8] sm:$0xff]  ;;  %4116 = vmatpush.bf16.msra.mxu2 %v6713_v38  ;;  %v2024_v22 = vadd.f32 %v8092_v20, %v1996_v13  ;;  %v8325_v20 = vld [vmem:[%s8770_s0 + $0x3cc] sm:$0xff]  ;;  %v2370_v26 = vunpack.c.l.b16 %v5195_v18  ;;  %v2371_v56 = vunpack.c.h.b16 %v5195_v18 }
 0x1b3   :  { %3114 = vmatmul.bf16.gmra.mxu2 %v5412_v40  ;;  %5157 = vst [vmem:[%s8771_s2 + $0x48] sm:$0xff] %v2073_v5  ;;  %4144 = vmatpush.bf16.msra.mxu3 %v6721_v14  ;;  %v1999_v5 = vadd.f32 %v8112_v37, %v1971_v61  ;;  %v6720_v37 = vld [vmem:[%s8769_s1 + $0x8f0] sm:$0xff]  ;;  %v6717_v18 = vld [vmem:[%s8769_s1 + $0x8d8] sm:$0xff] }
 0x1b4   :  { %3933 = vmatmul.bf16.gmra.mxu3 %v5962_v55  ;;  %v2406_v15 = vpack.c.b16 %v2370_v26, %v2370_v26  ;;  %v2407_v21 = vpack.c.b16 %v2371_v56, %v2371_v56  ;;  %4061 = vmatpush.bf16.msra.mxu0 %v6696_v44  ;;  %v5963_v26 = vld [vmem:[%s8770_s0 + $0x360] sm:$0xf0]  ;;  %v6692_v44 = vld [vmem:[%s8769_s1 + $0x810] sm:$0xff] }
 0x1b5   :  { %v5969_v56 = vld [vmem:[%s8770_s0 + $0x344] sm:$0xf] }
 0x1b6   :  { %v2891_v31 = vpop.f32.mrf.mxu2  ;;  %v2046_v6 = vpop.f32.mrf.mxu0  ;;  %4117 = vmatpush.bf16.msra.mxu2 %v6712_v4  ;;  %v6708_v4 = vld [vmem:[%s8769_s1 + $0x890] sm:$0xff] }
 0x1b7   :  { %v2919_v28 = vpop.f32.mrf.mxu3  ;;  %v2074_v10 = vpop.f32.mrf.mxu1  ;;  %v2047_v34 = vadd.f32 %v2046_v6, %v2019_v58  ;;  %v2372_v58 = vunpack.c.l.b16 %v5196_v24  ;;  %4145 = vmatpush.bf16.msra.mxu3 %v6720_v37  ;;  %v6716_v37 = vld [vmem:[%s8769_s1 + $0x8d0] sm:$0xff] }
 0x1b8   :  { %v8245_v3 = vadd.f32 %v2919_v28, %v2891_v31  ;;  %v3407_v31 = vunpack.c.l.b16 %v8325_v20  ;;  %v2027_v28 = vadd.f32 %v8114_v41, %v1999_v5  ;;  %v6704_v41 = vld [vmem:[%s8769_s1 + $0x870] sm:$0xff] }
 0x1b9   :  { %v2075_v27 = vadd.f32 %v2074_v10, %v2047_v34  ;;  %v2408_v63 = vpack.c.b16 %v2372_v58, %v2372_v58  ;;  %4089 = vmatpush.bf16.msra.mxu1 %v6704_v41  ;;  %v6637_v58 = vld [vmem:[%s8770_s0 + $0x364] sm:$0xf0]  ;;  %v6700_v41 = vld [vmem:[%s8769_s1 + $0x850] sm:$0xff] }
 0x1ba   :  { %v3443_v36 = vpack.c.b16 %v3407_v31, %v3407_v31  ;;  %4118 = vmatpush.bf16.msra.mxu2 %v6711_v39  ;;  %v6633_v31 = vld [vmem:[%s8770_s0 + $0x348] sm:$0xf] }
 0x1bb   :  { %5158 = vst [vmem:[%s8771_s2 + $0x50] sm:$0xff] %v2075_v27  ;;  %4146 = vmatpush.bf16.msra.mxu3 %v6719_v49  ;;  %v6707_v39 = vld [vmem:[%s8769_s1 + $0x888] sm:$0xff] }
 0x1bc   :  { %v6715_v49 = vld [vmem:[%s8769_s1 + $0x8c8] sm:$0xff] }
 0x1be   :  { %v2893_v0 = vpop.f32.mrf.mxu2  ;;  %v2049_v59 = vpop.f32.mrf.mxu0  ;;  %4119 = vmatpush.bf16.msra.mxu2 %v6710_v33  ;;  %v6714_v33 = vld [vmem:[%s8769_s1 + $0x8c0] sm:$0xff] }
 0x1bf   :  { %v2921_v54 = vpop.f32.mrf.mxu3  ;;  %v2077_v62 = vpop.f32.mrf.mxu1  ;;  %v2050_v60 = vadd.f32 %v2049_v59, %v2022_v32  ;;  %v6623_v32 = vld [vmem:[%s8770_s0 + $0x2f8] sm:$0xf]  ;;  %v6624_v59 = vld [vmem:[%s8770_s0 + $0x300] sm:$0xf] }
 0x1c0   :  { %v8297_v42 = vadd.f32 %v2921_v54, %v2893_v0  ;;  %v5927_v0 = vld [vmem:[%s8770_s0 + $0x318] sm:$0xf0] }
 0x1c1   :  { %v2078_v19 = vadd.f32 %v2077_v62, %v2050_v60  ;;  %3063 = vmatmul.bf16.gmra.mxu0 %v5440_v35  ;;  %v5933_v54 = vld [vmem:[%s8770_s0 + $0x2fc] sm:$0xf]  ;;  %v6695_v35 = vld [vmem:[%s8769_s1 + $0x828] sm:$0xff]  ;;  %v6718_v62 = vld [vmem:[%s8769_s1 + $0x8e0] sm:$0xff] }
 0x1c2   :  { %3091 = vmatmul.bf16.gmra.mxu1 %v5444_v57  ;;  %v6703_v57 = vld [vmem:[%s8769_s1 + $0x868] sm:$0xff]  ;;  %4062 = vmatpush.bf16.msra.mxu0 %v6695_v35  ;;  %v5934_v38 = vor.u32 %v6628_v11, %v5933_v54  ;;  %v6706_v54 = vld [vmem:[%s8769_s1 + $0x880] sm:$0xff] }
 0x1c3   :  { %3119 = vmatmul.bf16.gmra.mxu2 %v5448_v1  ;;  %5159 = vst [vmem:[%s8771_s2 + $0x58] sm:$0xff] %v2078_v19  ;;  %v5935_v1 = vld [vmem:[%s8770_s0 + $0x320] sm:$0xf0]  ;;  %4090 = vmatpush.bf16.msra.mxu1 %v6703_v57  ;;  %v5930_v19 = vor.u32 %v6623_v32, %v5927_v0  ;;  %v6691_v32 = vld [vmem:[%s8769_s1 + $0x808] sm:$0xff] }
 0x1c4   :  { %3938 = vmatmul.bf16.gmra.mxu3 %v5998_v30  ;;  %v5941_v30 = vld [vmem:[%s8770_s0 + $0x304] sm:$0xf]  ;;  %v6699_v0 = vld [vmem:[%s8769_s1 + $0x848] sm:$0xff] }
 0x1c5   :  { %4147 = vmatpush.bf16.msra.mxu3 %v6718_v62  ;;  %v6641_v35 = vld [vmem:[%s8770_s0 + $0x388] sm:$0xf]  ;;  %v5999_v57 = vld [vmem:[%s8770_s0 + $0x3a8] sm:$0xf0]  ;;  %v6642_v62 = vld [vmem:[%s8770_s0 + $0x390] sm:$0xf] }
 0x1c6   :  { %v2896_v2 = vpop.f32.mrf.mxu2  ;;  %v2051_v55 = vpop.f32.mrf.mxu0  ;;  %v6005_v11 = vld [vmem:[%s8770_s0 + $0x38c] sm:$0xf] }
 0x1c7   :  { %v2924_v7 = vpop.f32.mrf.mxu3  ;;  %v2079_v17 = vpop.f32.mrf.mxu1  ;;  %v2052_v45 = vadd.f32 %v2051_v55, %v2024_v22  ;;  %v5938_v22 = vor.u32 %v6624_v59, %v5935_v1  ;;  %v6702_v55 = vld [vmem:[%s8769_s1 + $0x860] sm:$0xff]  ;;  %v6646_v59 = vld [vmem:[%s8770_s0 + $0x3ac] sm:$0xf0]  ;;  %v6007_v1 = vld [vmem:[%s8770_s0 + $0x3b0] sm:$0xf0] }
 0x1c8   :  { %v8313_v40 = vadd.f32 %v2924_v7, %v2896_v2  ;;  %v5942_v2 = vor.u32 %v6629_v9, %v5941_v30  ;;  %v6694_v7 = vld [vmem:[%s8769_s1 + $0x820] sm:$0xff]  ;;  %4091 = vmatpush.bf16.msra.mxu1 %v6702_v55  ;;  %v6013_v30 = vld [vmem:[%s8770_s0 + $0x394] sm:$0xf]  ;;  %v6647_v9 = vld [vmem:[%s8770_s0 + $0x3b4] sm:$0xf0] }
 0x1c9   :  { %v2080_v25 = vadd.f32 %v2079_v17, %v2052_v45  ;;  %v6709_v17 = vld [vmem:[%s8769_s1 + $0x898] sm:$0xff]  ;;  %4063 = vmatpush.bf16.msra.mxu0 %v6694_v7  ;;  %4148 = vmatpush.bf16.msra.mxu3 %v6717_v18  ;;  %v6014_v18 = vor.u32 %v6647_v9, %v6013_v30 }
 0x1ca   :  { %4120 = vmatpush.bf16.msra.mxu2 %v6709_v17  ;;  %v6010_v17 = vor.u32 %v6642_v62, %v6007_v1 }
 0x1cb   :  { %5160 = vst [vmem:[%s8771_s2 + $0x60] sm:$0xff] %v2080_v25  ;;  %v6632_v25 = vld [vmem:[%s8770_s0 + $0x340] sm:$0xf] }
 0x1cc   :  { %4092 = vmatpush.bf16.msra.mxu1 %v6701_v29  ;;  %v5775_v29 = vld [vmem:[%s8770_s0 + $0x3d4] sm:$0xff] }
 0x1cd   :  { %4064 = vmatpush.bf16.msra.mxu0 %v6693_v51  ;;  %4149 = vmatpush.bf16.msra.mxu3 %v6716_v37  ;;  %v3410_v37 = vunpack.c.h.b16 %v5775_v29 }
 0x1ce   :  { %v2898_v6 = vpop.f32.mrf.mxu2  ;;  %v2054_v43 = vpop.f32.mrf.mxu0  ;;  %4121 = vmatpush.bf16.msra.mxu2 %v6708_v4  ;;  %v8552_v4 = vld [vmem:[%s8770_s0 + $0x3dc] sm:$0xff] }
 0x1cf   :  { %v2926_v10 = vpop.f32.mrf.mxu3  ;;  %v2082_v34 = vpop.f32.mrf.mxu1  ;;  %v2055_v27 = vadd.f32 %v2054_v43, %v2027_v28  ;;  %v5971_v28 = vld [vmem:[%s8770_s0 + $0x368] sm:$0xf0]  ;;  %v5966_v43 = vor.u32 %v6632_v25, %v5963_v26 }
 0x1d0   :  { %v8345_v52 = vadd.f32 %v2926_v10, %v2898_v6  ;;  %v5977_v6 = vld [vmem:[%s8770_s0 + $0x34c] sm:$0xf]  ;;  %v6638_v10 = vld [vmem:[%s8770_s0 + $0x36c] sm:$0xf0]  ;;  %4093 = vmatpush.bf16.msra.mxu1 %v6700_v41 }
 0x1d1   :  { %v2083_v48 = vadd.f32 %v2082_v34, %v2055_v27  ;;  %3068 = vmatmul.bf16.gmra.mxu0 %v2406_v15  ;;  %v5970_v34 = vor.u32 %v6637_v58, %v5969_v56  ;;  %v5974_v27 = vor.u32 %v6633_v31, %v5971_v28  ;;  %4150 = vmatpush.bf16.msra.mxu3 %v6715_v49  ;;  %v3408_v58 = vunpack.c.h.b16 %v8325_v20 }
 0x1d2   :  { %3096 = vmatmul.bf16.gmra.mxu1 %v2407_v21  ;;  %4065 = vmatpush.bf16.msra.mxu0 %v6692_v44  ;;  %v3409_v31 = vunpack.c.l.b16 %v5775_v29  ;;  %v3411_v28 = vunpack.c.l.b16 %v8552_v4  ;;  %v3446_v44 = vpack.c.b16 %v3410_v37, %v3410_v37 }
 0x1d3   :  { %3124 = vmatmul.bf16.gmra.mxu2 %v2408_v63  ;;  %5161 = vst [vmem:[%s8771_s2 + $0x68] sm:$0xff] %v2083_v48  ;;  %v5978_v48 = vor.u32 %v6638_v10, %v5977_v6 }
 0x1d4   :  { %3943 = vmatmul.bf16.gmra.mxu3 %v3443_v36  ;;  %4122 = vmatpush.bf16.msra.mxu2 %v6707_v39  ;;  %v3447_v41 = vpack.c.b16 %v3411_v28, %v3411_v28 }
 0x1d5   :  { %4094 = vmatpush.bf16.msra.mxu1 %v6699_v0  ;;  %4151 = vmatpush.bf16.msra.mxu3 %v6714_v33 }
 0x1d6   :  { %v2901_v12 = vpop.f32.mrf.mxu2  ;;  %v2056_v8 = vpop.f32.mrf.mxu0  ;;  %4066 = vmatpush.bf16.msra.mxu0 %v6691_v32 }
 0x1d7   :  { %v2929_v16 = vpop.f32.mrf.mxu3  ;;  %v2084_v53 = vpop.f32.mrf.mxu1 }
 0x1d8   :  { %v8362_v46 = vadd.f32 %v2929_v16, %v2901_v12  ;;  %4123 = vmatpush.bf16.msra.mxu2 %v6706_v54 }
 0x1de   :  { %v2903_v60 = vpop.f32.mrf.mxu2  ;;  %v8400_v14 = vpop.f32.mrf.mxu0 }
 0x1df   :  { %v2931_v13 = vpop.f32.mrf.mxu3  ;;  %v8402_v23 = vpop.f32.mrf.mxu1  ;;  %v2943_v20 = vadd.f32 %v8400_v14, %v8177_v47  ;;  %v5949_v47 = vld [vmem:[%s8770_s0 + $0x30c] sm:$0xf]  ;;  %v6630_v14 = vld [vmem:[%s8770_s0 + $0x32c] sm:$0xf0] }
 0x1e1   :  { %3956 = vmatmul.bf16.vlgmr.msrb.gmra.mxu0 %v5930_v19  ;;  %v6002_v19 = vor.u32 %v6641_v35, %v5999_v57  ;;  %v2971_v54 = vadd.f32 %v8402_v23, %v2943_v20  ;;  %v6625_v35 = vld [vmem:[%s8770_s0 + $0x308] sm:$0xf]  ;;  %v5943_v57 = vld [vmem:[%s8770_s0 + $0x328] sm:$0xf0]  ;;  %v6626_v23 = vld [vmem:[%s8770_s0 + $0x310] sm:$0xf] }
 0x1e2   :  { %3984 = vmatmul.bf16.vlgmr.msrb.gmra.mxu1 %v5934_v38  ;;  %v6006_v38 = vor.u32 %v6646_v59, %v6005_v11  ;;  %v5951_v11 = vld [vmem:[%s8770_s0 + $0x330] sm:$0xf0]  ;;  %v6631_v59 = vld [vmem:[%s8770_s0 + $0x334] sm:$0xf0]  ;;  %v5946_v9 = vor.u32 %v6625_v35, %v5943_v57 }
 0x1e3   :  { %4012 = vmatmul.bf16.vlgmr.msrb.gmra.mxu2 %v5938_v22  ;;  %v6690_v22 = vld [vmem:[%s8769_s1 + $0x800] sm:$0xff]  ;;  %v6635_v20 = vld [vmem:[%s8770_s0 + $0x358] sm:$0xf] }
 0x1e4   :  { %4040 = vmatmul.bf16.vlgmr.msrb.gmra.mxu3 %v5942_v2  ;;  %v6698_v2 = vld [vmem:[%s8769_s1 + $0x840] sm:$0xff]  ;;  %4067 = vmatpush.bf16.msra.mxu0 %v6690_v22 }
 0x1e5   :  { %4095 = vmatpush.bf16.msra.mxu1 %v6698_v2 }
 0x1e6   :  { %v8416_v61 = vpop.f32.mrf.mxu2  ;;  %v8420_v24 = vpop.f32.mrf.mxu0 }
 0x1e7   :  { %v8418_v45 = vpop.f32.mrf.mxu3  ;;  %v8422_v5 = vpop.f32.mrf.mxu1  ;;  %v2999_v33 = vadd.f32 %v8416_v61, %v2971_v54  ;;  %v5957_v61 = vld [vmem:[%s8770_s0 + $0x314] sm:$0xf]  ;;  %v2945_v62 = vadd.f32 %v8420_v24, %v8223_v50 }
 0x1e9   :  { %v2973_v29 = vadd.f32 %v8422_v5, %v2945_v62 }
 0x1ee   :  { %v8460_v15 = vpop.f32.mrf.mxu2  ;;  %v8464_v63 = vpop.f32.mrf.mxu0 }
 0x1ef   :  { %v8462_v21 = vpop.f32.mrf.mxu3  ;;  %v8466_v36 = vpop.f32.mrf.mxu1  ;;  %v2948_v50 = vadd.f32 %v8464_v63, %v8245_v3  ;;  %v6634_v3 = vld [vmem:[%s8770_s0 + $0x350] sm:$0xf]  ;;  %v5979_v63 = vld [vmem:[%s8770_s0 + $0x370] sm:$0xf0] }
 0x1f1   :  { %3961 = vmatmul.bf16.gmra.mxu0 %v5966_v43  ;;  %v3444_v43 = vpack.c.b16 %v3408_v58, %v3408_v58  ;;  %v2976_v5 = vadd.f32 %v8466_v36, %v2948_v50  ;;  %v6639_v36 = vld [vmem:[%s8770_s0 + $0x374] sm:$0xf0]  ;;  %v6649_v50 = vld [vmem:[%s8770_s0 + $0x3c4] sm:$0xf0] }
 0x1f2   :  { %3989 = vmatmul.bf16.gmra.mxu1 %v5970_v34  ;;  %v3445_v34 = vpack.c.b16 %v3409_v31, %v3409_v31  ;;  %v3001_v31 = vadd.f32 %v8460_v15, %v2973_v29  ;;  %v6021_v29 = vld [vmem:[%s8770_s0 + $0x39c] sm:$0xf] }
 0x1f3   :  { %4017 = vmatmul.bf16.gmra.mxu2 %v5974_v27 }
 0x1f4   :  { %4045 = vmatmul.bf16.gmra.mxu3 %v5978_v48 }
 0x1f6   :  { %v8480_v12 = vpop.f32.mrf.mxu2  ;;  %v8484_v8 = vpop.f32.mrf.mxu0 }
 0x1f7   :  { %v8482_v16 = vpop.f32.mrf.mxu3  ;;  %v8486_v53 = vpop.f32.mrf.mxu1  ;;  %v2950_v54 = vadd.f32 %v8484_v8, %v8297_v42 }
 0x1fe   :  { %v8524_v60 = vpop.f32.mrf.mxu2  ;;  %v8534_v7 = vpop.f32.mrf.mxu0 }
 0x1ff   :  { %v8526_v13 = vpop.f32.mrf.mxu3  ;;  %v8536_v55 = vpop.f32.mrf.mxu1 }
 0x201   :  { %3966 = vmatmul.bf16.gmra.mxu0 %v6002_v19  ;;  %v5950_v19 = vor.u32 %v6630_v14, %v5949_v47  ;;  %v5982_v47 = vor.u32 %v6634_v3, %v5979_v63 }
 0x202   :  { %3994 = vmatmul.bf16.gmra.mxu1 %v6006_v38  ;;  %v3027_v38 = vadd.f32 %v8418_v45, %v2999_v33  ;;  %v3029_v45 = vadd.f32 %v8462_v21, %v3001_v31  ;;  %v3004_v21 = vadd.f32 %v8480_v12, %v2976_v5  ;;  %v5993_v12 = vld [vmem:[%s8770_s0 + $0x35c] sm:$0xf]  ;;  %v6023_v31 = vld [vmem:[%s8770_s0 + $0x3c0] sm:$0xf0] }
 0x203   :  { %4022 = vmatmul.bf16.gmra.mxu2 %v6010_v17  ;;  %v5954_v17 = vor.u32 %v6626_v23, %v5951_v11 }
 0x204   :  { %4050 = vmatmul.bf16.gmra.mxu3 %v6014_v18  ;;  %v5958_v18 = vor.u32 %v6631_v59, %v5957_v61  ;;  %v3032_v23 = vadd.f32 %v8482_v16, %v3004_v21  ;;  %v2953_v16 = vadd.f32 %v8534_v7, %v8313_v40  ;;  %v6643_v40 = vld [vmem:[%s8770_s0 + $0x398] sm:$0xf]  ;;  %v6015_v7 = vld [vmem:[%s8770_s0 + $0x3b8] sm:$0xf0] }
 0x206   :  { %v8538_v25 = vpop.f32.mrf.mxu2  ;;  %v8542_v56 = vpop.f32.mrf.mxu0 }
 0x207   :  { %v8540_v26 = vpop.f32.mrf.mxu3  ;;  %v8544_v51 = vpop.f32.mrf.mxu1 }
 0x20e   :  { %v8556_v6 = vpop.f32.mrf.mxu2  ;;  %v8560_v27 = vpop.f32.mrf.mxu0 }
 0x20f   :  { %v8558_v10 = vpop.f32.mrf.mxu3  ;;  %v8562_v48 = vpop.f32.mrf.mxu1 }
 0x211   :  { %3971 = vmatmul.bf16.gmra.mxu0 %v3444_v43 }
 0x212   :  { %3999 = vmatmul.bf16.gmra.mxu1 %v3445_v34 }
 0x213   :  { %4027 = vmatmul.bf16.gmra.mxu2 %v3446_v44 }
 0x214   :  { %4055 = vmatmul.bf16.gmra.mxu3 %v3447_v41  ;;  %v5985_v41 = vld [vmem:[%s8770_s0 + $0x354] sm:$0xf] }
 0x215   :  { %v5986_v14 = vor.u32 %v6639_v36, %v5985_v41 }
 0x216   :  { %v8566_v39 = vpop.f32.mrf.mxu2  ;;  %v2959_v32 = vpop.f32.mrf.mxu0 }
 0x217   :  { %v8568_v49 = vpop.f32.mrf.mxu3  ;;  %v2987_v0 = vpop.f32.mrf.mxu1  ;;  %v5987_v32 = vld [vmem:[%s8770_s0 + $0x378] sm:$0xf0] }
 0x218   :  { %v6640_v0 = vld [vmem:[%s8770_s0 + $0x37c] sm:$0xf0]  ;;  %v5990_v62 = vor.u32 %v6635_v20, %v5987_v32 }
 0x21e   :  { %v3015_v1 = vpop.f32.mrf.mxu2  ;;  %v3054_v22 = vpop.f32.mrf.mxu0 }
 0x21f   :  { %v3043_v30 = vpop.f32.mrf.mxu3  ;;  %v3082_v2 = vpop.f32.mrf.mxu1  ;;  %v3055_v58 = vadd.f32 %v3054_v22, %v3027_v38  ;;  %v5994_v1 = vor.u32 %v6640_v0, %v5993_v12 }
 0x220   :  { %v2978_v30 = vadd.f32 %v8486_v53, %v2950_v54 }
 0x221   :  { %4068 = vmatmul.bf16.vlgmr.msra.gmra.mxu0 %v5946_v9  ;;  %v3083_v24 = vadd.f32 %v3082_v2, %v3055_v58  ;;  %v6644_v58 = vld [vmem:[%s8770_s0 + $0x3a0] sm:$0xf] }
 0x222   :  { %4096 = vmatmul.bf16.vlgmr.msra.gmra.mxu1 %v5950_v19  ;;  %v3006_v8 = vadd.f32 %v8524_v60, %v2978_v30  ;;  %v6026_v21 = vor.u32 %v6644_v58, %v6023_v31 }
 0x223   :  { %4124 = vmatmul.bf16.vlgmr.msra.gmra.mxu2 %v5954_v17 }
 0x224   :  { %4152 = vmatmul.bf16.vlgmr.msra.gmra.mxu3 %v5958_v18  ;;  %v3034_v53 = vadd.f32 %v8526_v13, %v3006_v8  ;;  %v2981_v18 = vadd.f32 %v8536_v55, %v2953_v16  ;;  %v6648_v55 = vld [vmem:[%s8770_s0 + $0x3bc] sm:$0xf0] }
 0x226   :  { %v3110_v37 = vpop.f32.mrf.mxu2  ;;  %v3056_v34 = vpop.f32.mrf.mxu0  ;;  %v3009_v13 = vadd.f32 %v8538_v25, %v2981_v18  ;;  %v6029_v25 = vld [vmem:[%s8770_s0 + $0x3a4] sm:$0xf] }
 0x227   :  { %v8603_v28 = vpop.f32.mrf.mxu3  ;;  %v3111_v43 = vadd.f32 %v3110_v37, %v3083_v24  ;;  %v3084_v44 = vpop.f32.mrf.mxu1  ;;  %v3057_v15 = vadd.f32 %v3056_v34, %v3029_v45  ;;  %v2955_v24 = vadd.f32 %v8542_v56, %v8345_v52  ;;  %v6018_v34 = vor.u32 %v6643_v40, %v6015_v7 }
 0x228   :  { %v3037_v5 = vadd.f32 %v8540_v26, %v3009_v13  ;;  %v6030_v41 = vor.u32 %v6649_v50, %v6029_v25  ;;  %v2958_v26 = vadd.f32 %v8560_v27, %v8362_v46 }
 0x229   :  { %5737 = vst [vmem:[%s8771_s2 + $0x70] sm:$0xff] %v3111_v43  ;;  %v3085_v35 = vadd.f32 %v3084_v44, %v3057_v15  ;;  %v6022_v44 = vor.u32 %v6648_v55, %v6021_v29  ;;  %v2983_v36 = vadd.f32 %v8544_v51, %v2955_v24 }
 0x22b   :  { %v3011_v56 = vadd.f32 %v8556_v6, %v2983_v36  ;;  %v5778_v6 = vld [vmem:[%s8770_s0 + $0x3ec] sm:$0xf] }
 0x22d   :  { %v3039_v51 = vadd.f32 %v8558_v10, %v3011_v56  ;;  %v3412_v10 = vunpack.c.h.b16 %v8552_v4 }
 0x22e   :  { %v3112_v57 = vpop.f32.mrf.mxu2  ;;  %v3059_v61 = vpop.f32.mrf.mxu0 }
 0x22f   :  { %v8637_v33 = vpop.f32.mrf.mxu3  ;;  %v3113_v11 = vadd.f32 %v3112_v57, %v3085_v35  ;;  %v3087_v59 = vpop.f32.mrf.mxu1  ;;  %v3060_v42 = vadd.f32 %v3059_v61, %v3032_v23  ;;  %v5777_v57 = vld [vmem:[%s8770_s0 + $0x3e4] sm:$0xff] }
 0x230   :  { %v3413_v27 = vunpack.c.l.b16 %v5777_v57  ;;  %v3414_v23 = vunpack.c.h.b16 %v5777_v57 }
 0x231   :  { %5738 = vst [vmem:[%s8771_s2 + $0x78] sm:$0xff] %v3113_v11  ;;  %4073 = vmatmul.bf16.gmra.mxu0 %v5982_v47  ;;  %v3088_v9 = vadd.f32 %v3087_v59, %v3060_v42  ;;  %v2986_v47 = vadd.f32 %v8562_v48, %v2958_v26  ;;  %v3415_v11 = vunpack.c.l.b16 %v5778_v6 }
 0x232   :  { %4101 = vmatmul.bf16.gmra.mxu1 %v5986_v14  ;;  %v3449_v30 = vpack.c.b16 %v3413_v27, %v3413_v27 }
 0x233   :  { %4129 = vmatmul.bf16.gmra.mxu2 %v5990_v62  ;;  %v3014_v14 = vadd.f32 %v8566_v39, %v2986_v47 }
 0x234   :  { %4157 = vmatmul.bf16.gmra.mxu3 %v5994_v1  ;;  %v3448_v1 = vpack.c.b16 %v3412_v10, %v3412_v10 }
 0x235   :  { %v3042_v48 = vadd.f32 %v8568_v49, %v3014_v14 }
 0x236   :  { %v3115_v19 = vpop.f32.mrf.mxu2  ;;  %v3061_v2 = vpop.f32.mrf.mxu0 }
 0x237   :  { %v8647_v38 = vpop.f32.mrf.mxu3  ;;  %v3116_v22 = vadd.f32 %v3115_v19, %v3088_v9  ;;  %v3089_v17 = vpop.f32.mrf.mxu1  ;;  %v3062_v60 = vadd.f32 %v3061_v2, %v3034_v53  ;;  %v3450_v9 = vpack.c.b16 %v3414_v23, %v3414_v23  ;;  %v3451_v19 = vpack.c.b16 %v3415_v11, %v3415_v11 }
 0x239   :  { %5739 = vst [vmem:[%s8771_s2 + $0x80] sm:$0xff] %v3116_v22  ;;  %v3090_v37 = vadd.f32 %v3089_v17, %v3062_v60 }
 0x23e   :  { %v3117_v45 = vpop.f32.mrf.mxu2  ;;  %v3064_v3 = vpop.f32.mrf.mxu0 }
 0x23f   :  { %v8681_v43 = vpop.f32.mrf.mxu3  ;;  %v3118_v15 = vadd.f32 %v3117_v45, %v3090_v37  ;;  %v3092_v63 = vpop.f32.mrf.mxu1  ;;  %v3065_v52 = vadd.f32 %v3064_v3, %v3037_v5 }
 0x241   :  { %5740 = vst [vmem:[%s8771_s2 + $0x88] sm:$0xff] %v3118_v15  ;;  %4078 = vmatmul.bf16.gmra.mxu0 %v6018_v34  ;;  %v3093_v20 = vadd.f32 %v3092_v63, %v3065_v52 }
 0x242   :  { %4106 = vmatmul.bf16.gmra.mxu1 %v6022_v44 }
 0x243   :  { %4134 = vmatmul.bf16.gmra.mxu2 %v6026_v21 }
 0x244   :  { %4162 = vmatmul.bf16.gmra.mxu3 %v6030_v41 }
 0x246   :  { %v3120_v32 = vpop.f32.mrf.mxu2  ;;  %v3066_v54 = vpop.f32.mrf.mxu0 }
 0x247   :  { %v8691_v12 = vpop.f32.mrf.mxu3  ;;  %v3121_v0 = vadd.f32 %v3120_v32, %v3093_v20  ;;  %v3094_v35 = vpop.f32.mrf.mxu1  ;;  %v3067_v46 = vadd.f32 %v3066_v54, %v3039_v51 }
 0x249   :  { %5741 = vst [vmem:[%s8771_s2 + $0x90] sm:$0xff] %v3121_v0  ;;  %v3095_v61 = vadd.f32 %v3094_v35, %v3067_v46 }
 0x24e   :  { %v3122_v59 = vpop.f32.mrf.mxu2  ;;  %v3069_v8 = vpop.f32.mrf.mxu0 }
 0x24f   :  { %v8706_v62 = vpop.f32.mrf.mxu3  ;;  %v3123_v42 = vadd.f32 %v3122_v59, %v3095_v61  ;;  %v3097_v16 = vpop.f32.mrf.mxu1  ;;  %v3070_v4 = vadd.f32 %v3069_v8, %v3042_v48 }
 0x251   :  { %5742 = vst [vmem:[%s8771_s2 + $0x98] sm:$0xff] %v3123_v42  ;;  %4083 = vmatmul.bf16.gmra.mxu0 %v3448_v1  ;;  %v3098_v39 = vadd.f32 %v3097_v16, %v3070_v4 }
 0x252   :  { %4111 = vmatmul.bf16.gmra.mxu1 %v3449_v30 }
 0x253   :  { %4139 = vmatmul.bf16.gmra.mxu2 %v3450_v9 }
 0x254   :  { %4167 = vmatmul.bf16.gmra.mxu3 %v3451_v19 }
 0x256   :  { %v3125_v53 = vpop.f32.mrf.mxu2  ;;  %v3071_v49 = vpop.f32.mrf.mxu0 }
 0x257   :  { %v8712_v22 = vpop.f32.mrf.mxu3  ;;  %v3126_v2 = vadd.f32 %v3125_v53, %v3098_v39  ;;  %v3099_v17 = vpop.f32.mrf.mxu1 }
 0x259   :  { %5743 = vst [vmem:[%s8771_s2 + $0xa0] sm:$0xff] %v3126_v2 }
 0x25e   :  { %v3127_v18 = vpop.f32.mrf.mxu2  ;;  %v3957_v40 = vpop.f32.mrf.mxu0 }
 0x25f   :  { %v3946_v60 = vpop.f32.mrf.mxu3  ;;  %v3985_v7 = vpop.f32.mrf.mxu1  ;;  %v3958_v51 = vadd.f32 %v3957_v40, %v8603_v28 }
 0x261   :  { %v3986_v6 = vadd.f32 %v3985_v7, %v3958_v51 }
 0x266   :  { %v4013_v13 = vpop.f32.mrf.mxu2  ;;  %v3959_v55 = vpop.f32.mrf.mxu0 }
 0x267   :  { %v4041_v29 = vpop.f32.mrf.mxu3  ;;  %v3987_v58 = vpop.f32.mrf.mxu1  ;;  %v4014_v47 = vadd.f32 %v4013_v13, %v3986_v6  ;;  %v3960_v46 = vadd.f32 %v3959_v55, %v8637_v33 }
 0x269   :  { %v4042_v14 = vadd.f32 %v4041_v29, %v4014_v47  ;;  %v3988_v61 = vadd.f32 %v3987_v58, %v3960_v46 }
 0x26e   :  { %v4015_v31 = vpop.f32.mrf.mxu2  ;;  %v3962_v50 = vpop.f32.mrf.mxu0 }
 0x26f   :  { %v4043_v25 = vpop.f32.mrf.mxu3  ;;  %v3990_v24 = vpop.f32.mrf.mxu1  ;;  %v4016_v1 = vadd.f32 %v4015_v31, %v3988_v61  ;;  %v3963_v28 = vadd.f32 %v3962_v50, %v8647_v38 }
 0x271   :  { %v4044_v8 = vadd.f32 %v4043_v25, %v4016_v1  ;;  %v3991_v4 = vadd.f32 %v3990_v24, %v3963_v28 }
 0x276   :  { %v4018_v37 = vpop.f32.mrf.mxu2  ;;  %v3964_v34 = vpop.f32.mrf.mxu0 }
 0x277   :  { %v4046_v45 = vpop.f32.mrf.mxu3  ;;  %v3992_v44 = vpop.f32.mrf.mxu1  ;;  %v4019_v53 = vadd.f32 %v4018_v37, %v3991_v4  ;;  %v3965_v2 = vadd.f32 %v3964_v34, %v8681_v43 }
 0x279   :  { %v4047_v18 = vadd.f32 %v4046_v45, %v4019_v53  ;;  %v3993_v13 = vadd.f32 %v3992_v44, %v3965_v2 }
 0x27e   :  { %v4020_v5 = vpop.f32.mrf.mxu2  ;;  %v3967_v3 = vpop.f32.mrf.mxu0 }
 0x27f   :  { %v4048_v15 = vpop.f32.mrf.mxu3  ;;  %v3995_v63 = vpop.f32.mrf.mxu1  ;;  %v4021_v58 = vadd.f32 %v4020_v5, %v3993_v13  ;;  %v3968_v31 = vadd.f32 %v3967_v3, %v8691_v12 }
 0x281   :  { %v4049_v24 = vadd.f32 %v4048_v15, %v4021_v58  ;;  %v3996_v51 = vadd.f32 %v3995_v63, %v3968_v31 }
 0x286   :  { %v4023_v21 = vpop.f32.mrf.mxu2  ;;  %v3969_v36 = vpop.f32.mrf.mxu0 }
 0x287   :  { %v8717_v41 = vpop.f32.mrf.mxu3  ;;  %v8719_v52 = vpop.f32.mrf.mxu1  ;;  %v4024_v44 = vadd.f32 %v4023_v21, %v3996_v51  ;;  %v3970_v5 = vadd.f32 %v3969_v36, %v8706_v62 }
 0x289   :  { %v4052_v3 = vadd.f32 %v8717_v41, %v4024_v44 }
 0x28e   :  { %v8721_v56 = vpop.f32.mrf.mxu2  ;;  %v8725_v20 = vpop.f32.mrf.mxu0 }
 0x28f   :  { %v8723_v26 = vpop.f32.mrf.mxu3  ;;  %v8727_v32 = vpop.f32.mrf.mxu1  ;;  %v3973_v62 = vadd.f32 %v8725_v20, %v8712_v22 }
 0x296   :  { %v8730_v0 = vpop.f32.mrf.mxu2  ;;  %v3974_v35 = vpop.f32.mrf.mxu0 }
 0x297   :  { %v8732_v54 = vpop.f32.mrf.mxu3  ;;  %v4002_v57 = vpop.f32.mrf.mxu1 }
 0x29e   :  { %v4030_v10 = vpop.f32.mrf.mxu2  ;;  %v4069_v23 = vpop.f32.mrf.mxu0 }
 0x29f   :  { %v4058_v27 = vpop.f32.mrf.mxu3  ;;  %v4097_v11 = vpop.f32.mrf.mxu1  ;;  %v4070_v59 = vadd.f32 %v4069_v23, %v4042_v14 }
 0x2a0   :  { %v3998_v27 = vadd.f32 %v8719_v52, %v3970_v5  ;;  %v4001_v52 = vadd.f32 %v8727_v32, %v3973_v62 }
 0x2a1   :  { %v4098_v30 = vadd.f32 %v4097_v11, %v4070_v59 }
 0x2a2   :  { %v4026_v21 = vadd.f32 %v8721_v56, %v3998_v27  ;;  %v4029_v56 = vadd.f32 %v8730_v0, %v4001_v52 }
 0x2a4   :  { %v4054_v41 = vadd.f32 %v8723_v26, %v4026_v21 }
 0x2a6   :  { %v4125_v48 = vpop.f32.mrf.mxu2  ;;  %v4071_v9 = vpop.f32.mrf.mxu0 }
 0x2a7   :  { %v4153_v42 = vpop.f32.mrf.mxu3  ;;  %v4126_v16 = vadd.f32 %v4125_v48, %v4098_v30  ;;  %v4099_v19 = vpop.f32.mrf.mxu1  ;;  %v4072_v33 = vadd.f32 %v4071_v9, %v4044_v8 }
 0x2a9   :  { %v4154_v39 = vadd.f32 %v4153_v42, %v4126_v16  ;;  %v4100_v49 = vadd.f32 %v4099_v19, %v4072_v33  ;;  %v4057_v42 = vadd.f32 %v8732_v54, %v4029_v56 }
 0x2ab   :  { %6319 = vst [vmem:[%s8771_s2 + $0xa8] sm:$0xff] %v4154_v39 }
 0x2ae   :  { %v4127_v17 = vpop.f32.mrf.mxu2  ;;  %v4074_v40 = vpop.f32.mrf.mxu0 }
 0x2af   :  { %v4155_v38 = vpop.f32.mrf.mxu3  ;;  %v4128_v60 = vadd.f32 %v4127_v17, %v4100_v49  ;;  %v4102_v7 = vpop.f32.mrf.mxu1  ;;  %v4075_v55 = vadd.f32 %v4074_v40, %v4047_v18 }
 0x2b1   :  { %v4156_v29 = vadd.f32 %v4155_v38, %v4128_v60  ;;  %v4103_v25 = vadd.f32 %v4102_v7, %v4075_v55 }
 0x2b3   :  { %6320 = vst [vmem:[%s8771_s2 + $0xb0] sm:$0xff] %v4156_v29 }
 0x2b6   :  { %v4130_v50 = vpop.f32.mrf.mxu2  ;;  %v4076_v34 = vpop.f32.mrf.mxu0 }
 0x2b7   :  { %v4158_v43 = vpop.f32.mrf.mxu3  ;;  %v4131_v37 = vadd.f32 %v4130_v50, %v4103_v25  ;;  %v4104_v45 = vpop.f32.mrf.mxu1  ;;  %v4077_v57 = vadd.f32 %v4076_v34, %v4049_v24 }
 0x2b9   :  { %v4159_v35 = vadd.f32 %v4158_v43, %v4131_v37  ;;  %v4105_v6 = vadd.f32 %v4104_v45, %v4077_v57 }
 0x2bb   :  { %6321 = vst [vmem:[%s8771_s2 + $0xb8] sm:$0xff] %v4159_v35 }
 0x2be   :  { %v4132_v47 = vpop.f32.mrf.mxu2  ;;  %v4079_v15 = vpop.f32.mrf.mxu0 }
 0x2bf   :  { %v4160_v12 = vpop.f32.mrf.mxu3  ;;  %v4133_v46 = vadd.f32 %v4132_v47, %v4105_v6  ;;  %v4107_v10 = vpop.f32.mrf.mxu1  ;;  %v4080_v14 = vadd.f32 %v4079_v15, %v4052_v3 }
 0x2c1   :  { %v4161_v63 = vadd.f32 %v4160_v12, %v4133_v46  ;;  %v4108_v36 = vadd.f32 %v4107_v10, %v4080_v14 }
 0x2c3   :  { %6322 = vst [vmem:[%s8771_s2 + $0xc0] sm:$0xff] %v4161_v63 }
 0x2c6   :  { %v4135_v23 = vpop.f32.mrf.mxu2  ;;  %v4081_v59 = vpop.f32.mrf.mxu0 }
 0x2c7   :  { %v4163_v11 = vpop.f32.mrf.mxu3  ;;  %v4136_v61 = vadd.f32 %v4135_v23, %v4108_v36  ;;  %v4109_v1 = vpop.f32.mrf.mxu1  ;;  %v4082_v30 = vadd.f32 %v4081_v59, %v4054_v41 }
 0x2c9   :  { %v4164_v28 = vadd.f32 %v4163_v11, %v4136_v61  ;;  %v4110_v48 = vadd.f32 %v4109_v1, %v4082_v30 }
 0x2cb   :  { %6323 = vst [vmem:[%s8771_s2 + $0xc8] sm:$0xff] %v4164_v28 }
 0x2ce   :  { %v4137_v22 = vpop.f32.mrf.mxu2  ;;  %v4084_v26 = vpop.f32.mrf.mxu0 }
 0x2cf   :  { %v4165_v20 = vpop.f32.mrf.mxu3  ;;  %v4138_v8 = vadd.f32 %v4137_v22, %v4110_v48  ;;  %v4112_v16 = vpop.f32.mrf.mxu1  ;;  %v4085_v19 = vadd.f32 %v4084_v26, %v4057_v42 }
 0x2d1   :  { %v4166_v9 = vadd.f32 %v4165_v20, %v4138_v8  ;;  %v4113_v32 = vadd.f32 %v4112_v16, %v4085_v19 }
 0x2d3   :  { %6324 = vst [vmem:[%s8771_s2 + $0xd0] sm:$0xff] %v4166_v9 }
 0x2d6   :  { %v4140_v0 = vpop.f32.mrf.mxu2  ;;  %v4086_v33 = vpop.f32.mrf.mxu0 }
 0x2d7   :  { %v4168_v4 = vpop.f32.mrf.mxu3  ;;  %v4141_v39 = vadd.f32 %v4140_v0, %v4113_v32  ;;  %v4114_v53 = vpop.f32.mrf.mxu1 }
 0x2d9   :  { %v4169_v2 = vadd.f32 %v4168_v4, %v4141_v39 }
 0x2db   :  { %6325 = vst [vmem:[%s8771_s2 + $0xd8] sm:$0xff] %v4169_v2 }
 0x2de   :  { %v4142_v54 = vpop.f32.mrf.mxu2 }
 0x2df   :  { %v4170_v49 = vpop.f32.mrf.mxu3 }

</bundles_post_ra>
